<compile_context>
chip_gen: v7x
topology: tpu7x:2x2x1
jax: 0.10.0
libtpu: 0.0.40
codegen_flags: <defaults>
</compile_context>

<pallas_src>
import functools

import jax
import jax.numpy as jnp
from jax.experimental import pallas as pl
from jax.experimental.pallas import tpu as pltpu


# Hidden layer sizes of the nn.Sequential in `Net`.
_HIDDEN_DIMS = [32, 64, 128, 64, 32, 1]


def _round_up(x, m):
    return ((x + m - 1) // m) * m


def _mlp_kernel(x_ref,
                w1, b1, w2, b2, w3, b3, w4, b4, w5, b5, w6t, b6,
                o_ref, *, precision):
    """Fused 6-layer MLP, transposed layout: activations are (features, TILE_B)."""
    cdt = w1.dtype                      # matmul operand dtype (f32 or bf16)
    h = x_ref[...].astype(cdt)          # (D, TILE_B), batch on lanes

    # Layers 1..5: MXU matmul (f32 accumulation) + f32 bias + ReLU on the VPU.
    for w_ref, b_ref in ((w1, b1), (w2, b2), (w3, b3), (w4, b4), (w5, b5)):
        h = jnp.dot(w_ref[...], h,
                    preferred_element_type=jnp.float32,
                    precision=precision) + b_ref[...]     # (out, TILE_B)
        h = jnp.maximum(h, 0.0).astype(cdt)

    # Layer 6 (32 -> 1): N=1 matmul would waste a full MXU pass, so do it as a
    # VPU multiply + cross-sublane reduce, producing the lane-dense (1, TILE_B)
    # output block directly.
    y = jnp.sum(h.astype(jnp.float32) * w6t[...].astype(jnp.float32),
                axis=0, keepdims=True) + b6[...]          # (1, TILE_B)
    o_ref[...] = y.astype(o_ref.dtype)


def _choose_tile_b(B, D, *, vmem_budget_bytes=32 * 1024 * 1024, max_tile_b=4096):
    """Pick a batch tile (multiple of 128) from the VMEM budget and batch size."""
    d_pad = _round_up(max(int(D), 1), 8)
    hidden_rows = sum(_HIDDEN_DIMS)
    # Per-batch-column f32 bytes: double-buffered x stream + double-buffered
    # (8-sublane padded) output block + layer intermediates.  Params are a
    # fixed < 1 MiB on top and ignored here.
    bytes_per_col = 4 * (2 * d_pad + 2 * 8 + hidden_rows)
    fit = max(128, vmem_budget_bytes // bytes_per_col)
    tile = max(128, min(max_tile_b, (fit // 128) * 128))

    b_pad128 = _round_up(B, 128)
    if b_pad128 >= 2 * 128:
        # Keep at least 2 grid steps so the "parallel" batch axis can be split
        # across v7x's two TensorCores (no-op on single-core v5e/v6e).
        tile = min(tile, _round_up(pl.cdiv(b_pad128, 2), 128))
    return min(tile, b_pad128)


def mlp_forward(x, params, *, tile_b=None, use_bf16=False,
                vmem_limit_bytes=48 * 1024 * 1024):
    """Fused forward pass of `Net`.

    x:      [B, D] float32.
    params: list of 6 (w, b) tuples in PyTorch nn.Linear layout
            (w: [out_features, in_features], b: [out_features]).
    """
    B, D = x.shape
    assert len(params) == len(_HIDDEN_DIMS)

    if tile_b is None:
        tile_b = _choose_tile_b(B, D)
    tile_b = max(128, _round_up(int(tile_b), 128))
    b_padded = _round_up(B, tile_b)

    op_dtype = jnp.bfloat16 if use_bf16 else jnp.float32
    precision = None if use_bf16 else jax.lax.Precision.HIGHEST

    # Transposed, lane-dense layout: x -> (D, b_padded), batch on lanes.
    xT = x.astype(op_dtype).T
    if b_padded != B:
        xT = jnp.pad(xT, ((0, 0), (0, b_padded - B)))

    flat = [xT]
    # x tile marches along the batch (lane) axis; weights/biases use constant
    # index maps so they are fetched once and stay VMEM-resident.
    in_specs = [pl.BlockSpec((D, tile_b), lambda i: (0, i))]
    n_layers = len(params)
    for li, (w, b) in enumerate(params):
        if li < n_layers - 1:
            wk = w.astype(op_dtype)                       # (out, in)
            bk = b.reshape(-1, 1).astype(jnp.float32)     # (out, 1) -> lane bcast
        else:
            wk = w.T.astype(op_dtype)                     # (32, 1) for VPU path
            bk = b.reshape(1, 1).astype(jnp.float32)      # (1, 1)
        flat.append(wk)
        flat.append(bk)
        in_specs.append(pl.BlockSpec(wk.shape, lambda i: (0, 0)))
        in_specs.append(pl.BlockSpec(bk.shape, lambda i: (0, 0)))

    out_specs = pl.BlockSpec((1, tile_b), lambda i: (0, i))

    # Advisory cost estimate for XLA scheduling around the custom call.
    dims = [D] + _HIDDEN_DIMS
    flops_per_col = sum(2 * dims[i] * dims[i + 1] for i in range(len(dims) - 1))
    param_bytes = sum(int(a.size) * a.dtype.itemsize for a in flat[1:])
    cost = pl.CostEstimate(
        flops=flops_per_col * b_padded,
        transcendentals=0,
        bytes_accessed=int(b_padded * D * jnp.dtype(op_dtype).itemsize
                           + b_padded * 4 + param_bytes),
    )

    out = pl.pallas_call(
        functools.partial(_mlp_kernel, precision=precision),
        out_shape=jax.ShapeDtypeStruct((1, b_padded), jnp.float32),
        grid=(b_padded // tile_b,),
        in_specs=in_specs,
        out_specs=out_specs,
        compiler_params=pltpu.CompilerParams(
            dimension_semantics=("parallel",),
            vmem_limit_bytes=vmem_limit_bytes,
        ),
        cost_estimate=cost,
    )(*flat)

    # (1, b_padded) lane-dense result -> (B, 1) like the PyTorch module.
    return out[0, :B].reshape(B, 1)


def init_params(key, input_dim):
    """nn.Linear-style init, PyTorch layout: w [out,in], b [out]."""
    dims = [input_dim] + _HIDDEN_DIMS
    params = []
    for i in range(len(dims) - 1):
        fan_in, fan_out = dims[i], dims[i + 1]
        key, kw, kb = jax.random.split(key, 3)
        bound = 1.0 / jnp.sqrt(fan_in)
        w = jax.random.uniform(kw, (fan_out, fan_in), jnp.float32, -bound, bound)
        b = jax.random.uniform(kb, (fan_out,), jnp.float32, -bound, bound)
        params.append((w, b))
    return params


def reference_forward(x, params):
    h = x
    for i, (w, b) in enumerate(params):
        h = h @ w.T + b
        if i < len(params) - 1:
            h = jnp.maximum(h, 0.0)
    return h


if __name__ == "__main__":
    key = jax.random.PRNGKey(0)
    key, kx = jax.random.split(key)

    # Small shapes consistent with the module: batch=8, input_dim=16.
    B, INPUT_DIM = 8, 16
    x = jax.random.normal(kx, (B, INPUT_DIM), dtype=jnp.float32)
    params = init_params(key, INPUT_DIM)

    out = jax.block_until_ready(mlp_forward(x, params))
    ref = reference_forward(x, params)
    assert out.shape == (B, 1), out.shape
    assert jnp.allclose(out, ref, atol=1e-4, rtol=1e-4), "mismatch vs reference"

    # Multi-step grid + padding path: B and D not multiples of the tile sizes.
    key, kx2 = jax.random.split(key)
    B2, D2 = 300, 40
    x2 = jax.random.normal(kx2, (B2, D2), dtype=jnp.float32)
    params2 = init_params(key, D2)
    out2 = jax.block_until_ready(mlp_forward(x2, params2))
    ref2 = reference_forward(x2, params2)
    assert out2.shape == (B2, 1), out2.shape
    assert jnp.allclose(out2, ref2, atol=1e-4, rtol=1e-4), "mismatch (padded path)"

    # Optional bf16 operand path (native-MXU throughput); loose tolerance.
    out3 = jax.block_until_ready(mlp_forward(x, params, use_bf16=True))
    assert out3.shape == (B, 1), out3.shape
    assert jnp.allclose(out3, ref, atol=5e-2, rtol=5e-2), "mismatch (bf16 path)"

    print("KERNEL_OK")
</pallas_src>

<mosaic_0001>
module attributes {stable_mosaic.version = 11 : i64} {
  func.func @_mlp_kernel(%arg0: i32, %arg1: memref<16x128xf32, #tpu.memory_space<vmem>>, %arg2: memref<32x16xf32, #tpu.memory_space<vmem>>, %arg3: memref<32x1xf32, #tpu.memory_space<vmem>>, %arg4: memref<64x32xf32, #tpu.memory_space<vmem>>, %arg5: memref<64x1xf32, #tpu.memory_space<vmem>>, %arg6: memref<128x64xf32, #tpu.memory_space<vmem>>, %arg7: memref<128x1xf32, #tpu.memory_space<vmem>>, %arg8: memref<64x128xf32, #tpu.memory_space<vmem>>, %arg9: memref<64x1xf32, #tpu.memory_space<vmem>>, %arg10: memref<32x64xf32, #tpu.memory_space<vmem>>, %arg11: memref<32x1xf32, #tpu.memory_space<vmem>>, %arg12: memref<32x1xf32, #tpu.memory_space<vmem>>, %arg13: memref<1x1xf32, #tpu.memory_space<vmem>>, %arg14: memref<1x128xf32, #tpu.memory_space<vmem>>) attributes {dimension_semantics = [#tpu.dimension_semantics<parallel>], iteration_bounds = array<i64: 1>, scalar_prefetch = 0 : i64, scratch_operands = 0 : i64, tpu.core_type = #tpu.core_type<tc>, window_params = [{transform_indices = @transform_0, window_bounds = array<i64: 16, 128>}, {pipeline_mode = #tpu.pipeline_mode<synchronous>, transform_indices = @transform_1, window_bounds = array<i64: 32, 16>}, {pipeline_mode = #tpu.pipeline_mode<synchronous>, transform_indices = @transform_2, window_bounds = array<i64: 32, 1>}, {pipeline_mode = #tpu.pipeline_mode<synchronous>, transform_indices = @transform_3, window_bounds = array<i64: 64, 32>}, {pipeline_mode = #tpu.pipeline_mode<synchronous>, transform_indices = @transform_4, window_bounds = array<i64: 64, 1>}, {pipeline_mode = #tpu.pipeline_mode<synchronous>, transform_indices = @transform_5, window_bounds = array<i64: 128, 64>}, {pipeline_mode = #tpu.pipeline_mode<synchronous>, transform_indices = @transform_6, window_bounds = array<i64: 128, 1>}, {pipeline_mode = #tpu.pipeline_mode<synchronous>, transform_indices = @transform_7, window_bounds = array<i64: 64, 128>}, {pipeline_mode = #tpu.pipeline_mode<synchronous>, transform_indices = @transform_8, window_bounds = array<i64: 64, 1>}, {pipeline_mode = #tpu.pipeline_mode<synchronous>, transform_indices = @transform_9, window_bounds = array<i64: 32, 64>}, {pipeline_mode = #tpu.pipeline_mode<synchronous>, transform_indices = @transform_10, window_bounds = array<i64: 32, 1>}, {pipeline_mode = #tpu.pipeline_mode<synchronous>, transform_indices = @transform_11, window_bounds = array<i64: 32, 1>}, {pipeline_mode = #tpu.pipeline_mode<synchronous>, transform_indices = @transform_12, window_bounds = array<i64: 1, 1>}, {transform_indices = @transform_13, window_bounds = array<i64: 1, 128>}]} {
    %c0 = arith.constant 0 : index
    %c0_0 = arith.constant 0 : index
    %0 = vector.load %arg1[%c0, %c0_0] : memref<16x128xf32, #tpu.memory_space<vmem>>, vector<16x128xf32>
    %c0_1 = arith.constant 0 : index
    %c0_2 = arith.constant 0 : index
    %1 = vector.load %arg2[%c0_1, %c0_2] : memref<32x16xf32, #tpu.memory_space<vmem>>, vector<32x16xf32>
    %cst = arith.constant dense<0.000000e+00> : vector<32x128xf32>
    %2 = tpu.matmul %1, %0, %cst {dimension_numbers = #tpu.dot_dimension_numbers<[1], [0], [0], [1], [0, 0, 1, 1], [], []>, precision = #tpu.contract_precision<fp32>} : vector<32x16xf32>, vector<16x128xf32>, vector<32x128xf32> -> vector<32x128xf32>
    %c0_3 = arith.constant 0 : index
    %c0_4 = arith.constant 0 : index
    %3 = vector.load %arg3[%c0_3, %c0_4] : memref<32x1xf32, #tpu.memory_space<vmem>>, vector<32x1xf32>
    %4 = vector.broadcast %3 : vector<32x1xf32> to vector<32x128xf32>
    %5 = arith.addf %2, %4 : vector<32x128xf32>
    %cst_5 = arith.constant 0.000000e+00 : f32
    %6 = vector.broadcast %cst_5 : f32 to vector<32x128xf32>
    %7 = arith.maximumf %5, %6 : vector<32x128xf32>
    %c0_6 = arith.constant 0 : index
    %c0_7 = arith.constant 0 : index
    %8 = vector.load %arg4[%c0_6, %c0_7] : memref<64x32xf32, #tpu.memory_space<vmem>>, vector<64x32xf32>
    %cst_8 = arith.constant dense<0.000000e+00> : vector<64x128xf32>
    %9 = tpu.matmul %8, %7, %cst_8 {dimension_numbers = #tpu.dot_dimension_numbers<[1], [0], [0], [1], [0, 0, 1, 1], [], []>, precision = #tpu.contract_precision<fp32>} : vector<64x32xf32>, vector<32x128xf32>, vector<64x128xf32> -> vector<64x128xf32>
    %c0_9 = arith.constant 0 : index
    %c0_10 = arith.constant 0 : index
    %10 = vector.load %arg5[%c0_9, %c0_10] : memref<64x1xf32, #tpu.memory_space<vmem>>, vector<64x1xf32>
    %11 = vector.broadcast %10 : vector<64x1xf32> to vector<64x128xf32>
    %12 = arith.addf %9, %11 : vector<64x128xf32>
    %cst_11 = arith.constant 0.000000e+00 : f32
    %13 = vector.broadcast %cst_11 : f32 to vector<64x128xf32>
    %14 = arith.maximumf %12, %13 : vector<64x128xf32>
    %c0_12 = arith.constant 0 : index
    %c0_13 = arith.constant 0 : index
    %15 = vector.load %arg6[%c0_12, %c0_13] : memref<128x64xf32, #tpu.memory_space<vmem>>, vector<128x64xf32>
    %cst_14 = arith.constant dense<0.000000e+00> : vector<128x128xf32>
    %16 = tpu.matmul %15, %14, %cst_14 {dimension_numbers = #tpu.dot_dimension_numbers<[1], [0], [0], [1], [0, 0, 1, 1], [], []>, precision = #tpu.contract_precision<fp32>} : vector<128x64xf32>, vector<64x128xf32>, vector<128x128xf32> -> vector<128x128xf32>
    %c0_15 = arith.constant 0 : index
    %c0_16 = arith.constant 0 : index
    %17 = vector.load %arg7[%c0_15, %c0_16] : memref<128x1xf32, #tpu.memory_space<vmem>>, vector<128x1xf32>
    %18 = vector.broadcast %17 : vector<128x1xf32> to vector<128x128xf32>
    %19 = arith.addf %16, %18 : vector<128x128xf32>
    %cst_17 = arith.constant 0.000000e+00 : f32
    %20 = vector.broadcast %cst_17 : f32 to vector<128x128xf32>
    %21 = arith.maximumf %19, %20 : vector<128x128xf32>
    %c0_18 = arith.constant 0 : index
    %c0_19 = arith.constant 0 : index
    %22 = vector.load %arg8[%c0_18, %c0_19] : memref<64x128xf32, #tpu.memory_space<vmem>>, vector<64x128xf32>
    %cst_20 = arith.constant dense<0.000000e+00> : vector<64x128xf32>
    %23 = tpu.matmul %22, %21, %cst_20 {dimension_numbers = #tpu.dot_dimension_numbers<[1], [0], [0], [1], [0, 0, 1, 1], [], []>, precision = #tpu.contract_precision<fp32>} : vector<64x128xf32>, vector<128x128xf32>, vector<64x128xf32> -> vector<64x128xf32>
    %c0_21 = arith.constant 0 : index
    %c0_22 = arith.constant 0 : index
    %24 = vector.load %arg9[%c0_21, %c0_22] : memref<64x1xf32, #tpu.memory_space<vmem>>, vector<64x1xf32>
    %25 = vector.broadcast %24 : vector<64x1xf32> to vector<64x128xf32>
    %26 = arith.addf %23, %25 : vector<64x128xf32>
    %cst_23 = arith.constant 0.000000e+00 : f32
    %27 = vector.broadcast %cst_23 : f32 to vector<64x128xf32>
    %28 = arith.maximumf %26, %27 : vector<64x128xf32>
    %c0_24 = arith.constant 0 : index
    %c0_25 = arith.constant 0 : index
    %29 = vector.load %arg10[%c0_24, %c0_25] : memref<32x64xf32, #tpu.memory_space<vmem>>, vector<32x64xf32>
    %cst_26 = arith.constant dense<0.000000e+00> : vector<32x128xf32>
    %30 = tpu.matmul %29, %28, %cst_26 {dimension_numbers = #tpu.dot_dimension_numbers<[1], [0], [0], [1], [0, 0, 1, 1], [], []>, precision = #tpu.contract_precision<fp32>} : vector<32x64xf32>, vector<64x128xf32>, vector<32x128xf32> -> vector<32x128xf32>
    %c0_27 = arith.constant 0 : index
    %c0_28 = arith.constant 0 : index
    %31 = vector.load %arg11[%c0_27, %c0_28] : memref<32x1xf32, #tpu.memory_space<vmem>>, vector<32x1xf32>
    %32 = vector.broadcast %31 : vector<32x1xf32> to vector<32x128xf32>
    %33 = arith.addf %30, %32 : vector<32x128xf32>
    %cst_29 = arith.constant 0.000000e+00 : f32
    %34 = vector.broadcast %cst_29 : f32 to vector<32x128xf32>
    %35 = arith.maximumf %33, %34 : vector<32x128xf32>
    %c0_30 = arith.constant 0 : index
    %c0_31 = arith.constant 0 : index
    %36 = vector.load %arg12[%c0_30, %c0_31] : memref<32x1xf32, #tpu.memory_space<vmem>>, vector<32x1xf32>
    %37 = vector.broadcast %36 : vector<32x1xf32> to vector<32x128xf32>
    %38 = arith.mulf %35, %37 : vector<32x128xf32>
    %cst_32 = arith.constant dense<0.000000e+00> : vector<128xf32>
    %39 = vector.multi_reduction <add>, %38, %cst_32 [0] : vector<32x128xf32> to vector<128xf32>
    %40 = vector.shape_cast %39 : vector<128xf32> to vector<1x128xf32>
    %c0_33 = arith.constant 0 : index
    %c0_34 = arith.constant 0 : index
    %41 = vector.load %arg13[%c0_33, %c0_34] : memref<1x1xf32, #tpu.memory_space<vmem>>, vector<1x1xf32>
    %42 = vector.broadcast %41 : vector<1x1xf32> to vector<1x128xf32>
    %43 = arith.addf %40, %42 : vector<1x128xf32>
    %c0_35 = arith.constant 0 : index
    %c0_36 = arith.constant 0 : index
    %44 = vector.load %arg14[%c0_35, %c0_36] : memref<1x128xf32, #tpu.memory_space<vmem>>, vector<1x128xf32>
    tpu.vector_store %arg14[%c0_35, %c0_36], %43 {strides = array<i32>} : memref<1x128xf32, #tpu.memory_space<vmem>>, vector<1x128xf32>,
    return
  }
  func.func @transform_0(%arg0: i32) -> (i32, i32) {
    %c0_i32 = arith.constant 0 : i32
    %c0_i32_0 = arith.constant 0 : i32
    return %c0_i32, %arg0 : i32, i32
  }
  func.func @transform_1(%arg0: i32) -> (i32, i32) {
    %c0_i32 = arith.constant 0 : i32
    %c0_i32_0 = arith.constant 0 : i32
    %c0_i32_1 = arith.constant 0 : i32
    return %c0_i32, %c0_i32_0 : i32, i32
  }
  func.func @transform_2(%arg0: i32) -> (i32, i32) {
    %c0_i32 = arith.constant 0 : i32
    %c0_i32_0 = arith.constant 0 : i32
    %c0_i32_1 = arith.constant 0 : i32
    return %c0_i32, %c0_i32_0 : i32, i32
  }
  func.func @transform_3(%arg0: i32) -> (i32, i32) {
    %c0_i32 = arith.constant 0 : i32
    %c0_i32_0 = arith.constant 0 : i32
    %c0_i32_1 = arith.constant 0 : i32
    return %c0_i32, %c0_i32_0 : i32, i32
  }
  func.func @transform_4(%arg0: i32) -> (i32, i32) {
    %c0_i32 = arith.constant 0 : i32
    %c0_i32_0 = arith.constant 0 : i32
    %c0_i32_1 = arith.constant 0 : i32
    return %c0_i32, %c0_i32_0 : i32, i32
  }
  func.func @transform_5(%arg0: i32) -> (i32, i32) {
    %c0_i32 = arith.constant 0 : i32
    %c0_i32_0 = arith.constant 0 : i32
    %c0_i32_1 = arith.constant 0 : i32
    return %c0_i32, %c0_i32_0 : i32, i32
  }
  func.func @transform_6(%arg0: i32) -> (i32, i32) {
    %c0_i32 = arith.constant 0 : i32
    %c0_i32_0 = arith.constant 0 : i32
    %c0_i32_1 = arith.constant 0 : i32
    return %c0_i32, %c0_i32_0 : i32, i32
  }
  func.func @transform_7(%arg0: i32) -> (i32, i32) {
    %c0_i32 = arith.constant 0 : i32
    %c0_i32_0 = arith.constant 0 : i32
    %c0_i32_1 = arith.constant 0 : i32
    return %c0_i32, %c0_i32_0 : i32, i32
  }
  func.func @transform_8(%arg0: i32) -> (i32, i32) {
    %c0_i32 = arith.constant 0 : i32
    %c0_i32_0 = arith.constant 0 : i32
    %c0_i32_1 = arith.constant 0 : i32
    return %c0_i32, %c0_i32_0 : i32, i32
  }
  func.func @transform_9(%arg0: i32) -> (i32, i32) {
    %c0_i32 = arith.constant 0 : i32
    %c0_i32_0 = arith.constant 0 : i32
    %c0_i32_1 = arith.constant 0 : i32
    return %c0_i32, %c0_i32_0 : i32, i32
  }
  func.func @transform_10(%arg0: i32) -> (i32, i32) {
    %c0_i32 = arith.constant 0 : i32
    %c0_i32_0 = arith.constant 0 : i32
    %c0_i32_1 = arith.constant 0 : i32
    return %c0_i32, %c0_i32_0 : i32, i32
  }
  func.func @transform_11(%arg0: i32) -> (i32, i32) {
    %c0_i32 = arith.constant 0 : i32
    %c0_i32_0 = arith.constant 0 : i32
    %c0_i32_1 = arith.constant 0 : i32
    return %c0_i32, %c0_i32_0 : i32, i32
  }
  func.func @transform_12(%arg0: i32) -> (i32, i32) {
    %c0_i32 = arith.constant 0 : i32
    %c0_i32_0 = arith.constant 0 : i32
    %c0_i32_1 = arith.constant 0 : i32
    return %c0_i32, %c0_i32_0 : i32, i32
  }
  func.func @transform_13(%arg0: i32) -> (i32, i32) {
    %c0_i32 = arith.constant 0 : i32
    %c0_i32_0 = arith.constant 0 : i32
    return %c0_i32, %arg0 : i32, i32
  }
}

</mosaic_0001>

<bundles_post_ra>
// kernel: tpu_custom_call.1
= control target key start
LH: loop header
LB: loop body
LE: loop exit
PB: predicated region body
PF: predicated region fallthrough
CT: control target
= control target key end

     0   :  { %s8152_s0 = inlined_call_operand.vmem [shape: f32[16,128], index: 0, kind: input, shape index: {}]   ;;  %s8153_s1 = inlined_call_operand.vmem [shape: f32[32,16], index: 1, kind: input, shape index: {}]   ;;  %s8154_s2 = inlined_call_operand.vmem [shape: f32[32,1], index: 2, kind: input, shape index: {}]   ;;  %s8155_s3 = inlined_call_operand.vmem [shape: f32[64,32], index: 3, kind: input, shape index: {}]   ;;  %s8156_s4 = inlined_call_operand.vmem [shape: f32[64,1], index: 4, kind: input, shape index: {}]   ;;  %s8157_s5 = inlined_call_operand.vmem [shape: f32[128,64], index: 5, kind: input, shape index: {}]   ;;  %s8158_s6 = inlined_call_operand.vmem [shape: f32[128,1], index: 6, kind: input, shape index: {}]   ;;  %s8159_s7 = inlined_call_operand.vmem [shape: f32[64,128], index: 7, kind: input, shape index: {}]   ;;  %s8160_s8 = inlined_call_operand.vmem [shape: f32[64,1], index: 8, kind: input, shape index: {}]   ;;  %s8161_s9 = inlined_call_operand.vmem [shape: f32[32,64], index: 9, kind: input, shape index: {}]   ;;  %s8162_s10 = inlined_call_operand.vmem [shape: f32[32,1], index: 10, kind: input, shape index: {}]   ;;  %s8163_s11 = inlined_call_operand.vmem [shape: f32[32,1], index: 11, kind: input, shape index: {}]   ;;  %s8164_s12 = inlined_call_operand.<no memory space> [shape: f32[1,1], index: 12, kind: input, shape index: {}]   ;;  %s8165_s13 = inlined_call_operand.hbm [shape: f32[1,128], index: 13, kind: output, shape index: {}]  }
   0x1   :  { %v18_v0 = vstv %s8164_s12 }
   0x2   :  { %19 = vst [vmem:[#allocation2] sm:$0x1] %v18_v0 }
   0x3   :  { %v47_v1 = vld [vmem:[%s8152_s0] sm:$0xff]  ;;  %v48_v2 = vld [vmem:[%s8152_s0 + $0x8] sm:$0xff]  ;;  %vm77_vm0 = vcmask 130048   ;;  %v51_v8 = vld [vmem:[%s8153_s1 + $0x10] sm:$0xff]  ;;  %v6703_v10 = vmov 0  }
   0x4   :  { %v49_v3 = vld [vmem:[%s8153_s1] sm:$0xff]  ;;  %v91_v4 = vand.u32 4294901760, %v47_v1  ;;  %v94_v5 = vand.u32 4294901760, %v48_v2  ;;  %v50_v7 = vld [vmem:[%s8153_s1 + $0x8] sm:$0xff]  ;;  %v52_v9 = vld [vmem:[%s8153_s1 + $0x18] sm:$0xff]  ;;  %6677 = vset.pattern.permute.xlu0 %v6703_v10  ;;  %6678 = vset.pattern.permute.xlu1 %v6703_v10  ;;  %v85_v13 = vsel %vm77_vm0, %v51_v8, 0 }
   0x5   :  { %v79_v6 = vsel %vm77_vm0, %v49_v3, 0  ;;  %v82_v12 = vsel %vm77_vm0, %v50_v7, 0  ;;  %v88_v14 = vsel %vm77_vm0, %v52_v9, 0  ;;  %v53_v15 = vld [vmem:[%s8154_s2] sm:$0xff]  ;;  %v6805_v18 = vand.u32 4294901760, %v85_v13  ;;  %v55_v20 = vld [vmem:[%s8154_s2 + $0x10] sm:$0xff] }
   0x6   :  { %v6796_v11 = vand.u32 4294901760, %v79_v6  ;;  %v6801_v16 = vpack.c.bf16 %v94_v5, %v91_v4  ;;  %v6803_v17 = vand.u32 4294901760, %v82_v12  ;;  %v6807_v19 = vand.u32 4294901760, %v88_v14  ;;  %59 = vperm.xlu0 %6677, %v53_v15   ;;  %v54_v24 = vld [vmem:[%s8154_s2 + $0x8] sm:$0xff]  ;;  %69 = vperm.xlu1 %6678, %v55_v20   ;;  %v56_v28 = vld [vmem:[%s8154_s2 + $0x18] sm:$0xff]  ;;  %v690_v38 = vld [vmem:[%s8156_s4] sm:$0xff] }
   0x7   :  { %v6815_v22 = vsub.f32 %v47_v1, %v91_v4  ;;  %v6817_v23 = vsub.f32 %v48_v2, %v94_v5  ;;  %v6827_v26 = vsub.f32 %v85_v13, %v6805_v18  ;;  %v691_v42 = vld [vmem:[%s8156_s4 + $0x8] sm:$0xff]  ;;  %v692_v50 = vld [vmem:[%s8156_s4 + $0x10] sm:$0xff]  ;;  %v693_v52 = vld [vmem:[%s8156_s4 + $0x18] sm:$0xff] }
   0x8   :  { %v6813_v21 = vsub.f32 %v79_v6, %v6796_v11  ;;  %5980 = vmatprep.subr.bf16.mxu0 %v6801_v16  ;;  %v6824_v25 = vsub.f32 %v82_v12, %v6803_v17  ;;  %v6830_v27 = vsub.f32 %v88_v14, %v6807_v19  ;;  %v694_v53 = vld [vmem:[%s8156_s4 + $0x20] sm:$0xff]  ;;  %v695_v54 = vld [vmem:[%s8156_s4 + $0x28] sm:$0xff] }
   0x9   :  { %5982 = vmatpush3.bf16.msra.mxu0 %v6801_v16  ;;  %v200_v30 = vand.u32 4294901760, %v6815_v22  ;;  %v207_v31 = vand.u32 4294901760, %v6817_v23  ;;  %v179_v33 = vand.u32 4294901760, %v6827_v26  ;;  %v5987_v49 = vpack.c.bf16 %v6817_v23, %v6815_v22 }
   0xa   :  { %v159_v29 = vand.u32 4294901760, %v6813_v21  ;;  %v169_v32 = vand.u32 4294901760, %v6824_v25  ;;  %v189_v34 = vand.u32 4294901760, %v6830_v27  ;;  %64 = vperm.xlu0 %6677, %v54_v24   ;;  %74 = vperm.xlu1 %6678, %v56_v28  }
   0xb   :  { %v201_v36 = vsub.f32 %v6815_v22, %v200_v30  ;;  %v208_v37 = vsub.f32 %v6817_v23, %v207_v31  ;;  %v180_v40 = vsub.f32 %v6827_v26, %v179_v33 }
   0xc   :  { %v160_v35 = vsub.f32 %v6813_v21, %v159_v29  ;;  %v170_v39 = vsub.f32 %v6824_v25, %v169_v32  ;;  %v190_v41 = vsub.f32 %v6830_v27, %v189_v34 }
   0xd   :  { %v202_v44 = vand.u32 4294901760, %v201_v36  ;;  %v209_v45 = vand.u32 4294901760, %v208_v37  ;;  %v181_v47 = vand.u32 4294901760, %v180_v40 }
   0xe   :  { %v161_v43 = vand.u32 4294901760, %v160_v35  ;;  %v171_v46 = vand.u32 4294901760, %v170_v39  ;;  %700 = vperm.xlu0 %6677, %v690_v38   ;;  %705 = vperm.xlu1 %6678, %v691_v42   ;;  %v191_v51 = vand.u32 4294901760, %v190_v41 }
   0xf   :  { %v5983_v48 = vpack.c.bf16 %v209_v45, %v202_v44 }
  0x10   :  { %5167 = vmatprep.mubr.f32.mxu0 %v161_v43 }
  0x11   :  { %5168 = vmatmul.mubr.f32.vlgmr.msra.gmra.mrb[0].mxu0 %v171_v46  ;;  %5984 = vmatprep.subr.bf16.mxu0 %v5983_v48 }
  0x12   :  { %5170 = vmatprep.mubr.f32.mxu0 %v181_v47  ;;  %5986 = vmatpush3.bf16.msra.mxu0 %v5983_v48 }
  0x13   :  { %710 = vperm.xlu0 %6677, %v692_v50   ;;  %5988 = vmatprep.subr.bf16.mxu0 %v5987_v49 }
  0x14   :  { %715 = vperm.xlu1 %6678, %v693_v52  }
  0x15   :  { %5171 = vmatmul.mubr.f32.gmra.mrb[2].mxu0 %v191_v51 }
  0x16   :  { %20 = vsyncpa [#allocation4], 0  ;;  %5177 = vmatprep.mubr.f32.mxu0 %v6796_v11  ;;  %v696_v55 = vld [vmem:[%s8156_s4 + $0x30] sm:$0xff]  ;;  %v697_v56 = vld [vmem:[%s8156_s4 + $0x38] sm:$0xff]  ;;  %v5995_v59 = vpack.c.bf16 %v207_v31, %v200_v30  ;;  %vm738_vm1 = vcmask 261120   ;;  %vm1669_vm2 = vcmask 523264  }
  0x17   :  { %720 = vperm.xlu0 %6677, %v694_v53   ;;  %v1573_v57 = vld [vmem:[%s8158_s6] sm:$0xff]  ;;  %v1574_v58 = vld [vmem:[%s8158_s6 + $0x8] sm:$0xff]  ;;  %v1575_v60 = vld [vmem:[%s8158_s6 + $0x10] sm:$0xff] }
  0x18   :  { %725 = vperm.xlu1 %6678, %v695_v54   ;;  %v1576_v61 = vld [vmem:[%s8158_s6 + $0x18] sm:$0xff]  ;;  %v1577_v62 = vld [vmem:[%s8158_s6 + $0x20] sm:$0xff]  ;;  %v1578_v63 = vld [vmem:[%s8158_s6 + $0x28] sm:$0xff] }
  0x19   :  { %5178 = vmatmul.mubr.f32.vlgmr.msra.gmra.mrb[0].mxu0 %v6803_v17  ;;  %v1579_v0 = vld [vmem:[%s8158_s6 + $0x30] sm:$0xff]  ;;  %v1580_v1 = vld [vmem:[%s8158_s6 + $0x38] sm:$0xff]  ;;  %v1581_v2 = vld [vmem:[%s8158_s6 + $0x40] sm:$0xff] }
  0x1a   :  { %5180 = vmatprep.mubr.f32.mxu0 %v6805_v18  ;;  %5990 = vmatpush3.bf16.msra.mxu0 %v5987_v49  ;;  %v1582_v3 = vld [vmem:[%s8158_s6 + $0x48] sm:$0xff]  ;;  %v1583_v4 = vld [vmem:[%s8158_s6 + $0x50] sm:$0xff]  ;;  %v1584_v5 = vld [vmem:[%s8158_s6 + $0x58] sm:$0xff] }
  0x1b   :  { %5992 = vmatprep.subr.bf16.mxu0 %v6801_v16  ;;  %730 = vperm.xlu0 %6677, %v696_v55   ;;  %v1585_v6 = vld [vmem:[%s8158_s6 + $0x60] sm:$0xff]  ;;  %v1586_v7 = vld [vmem:[%s8158_s6 + $0x68] sm:$0xff]  ;;  %v1587_v8 = vld [vmem:[%s8158_s6 + $0x70] sm:$0xff] }
  0x1c   :  { %735 = vperm.xlu1 %6678, %v697_v56   ;;  %v1588_v9 = vld [vmem:[%s8158_s6 + $0x78] sm:$0xff]  ;;  %v2924_v10 = vld [vmem:[%s8160_s8] sm:$0xff]  ;;  %v2926_v12 = vld [vmem:[%s8160_s8 + $0x10] sm:$0xff] }
  0x1d   :  { %5181 = vmatmul.mubr.f32.gmra.mrb[2].mxu0 %v6807_v19  ;;  %v2927_v13 = vld [vmem:[%s8160_s8 + $0x18] sm:$0xff]  ;;  %v2928_v14 = vld [vmem:[%s8160_s8 + $0x20] sm:$0xff]  ;;  %v2929_v15 = vld [vmem:[%s8160_s8 + $0x28] sm:$0xff] }
  0x1e   :  { %5187 = vmatprep.mubr.f32.mxu0 %v6813_v21  ;;  %v3928_v20 = vld [vmem:[%s8162_s10 + $0x10] sm:$0xff]  ;;  %v3929_v21 = vld [vmem:[%s8162_s10 + $0x18] sm:$0xff]  ;;  %v4632_v22 = vld [vmem:[%s8163_s11] sm:$0xff] }
  0x1f   :  { %1591 = vperm.xlu0 %6677, %v1573_v57   ;;  %v4633_v23 = vld [vmem:[%s8163_s11 + $0x8] sm:$0xff]  ;;  %v4634_v24 = vld [vmem:[%s8163_s11 + $0x10] sm:$0xff]  ;;  %v685_v41 = vld [vmem:[%s8155_s3 + $0x18] sm:$0xff] }
  0x20   :  { %1596 = vperm.xlu1 %6678, %v1574_v58   ;;  %v684_v37 = vld [vmem:[%s8155_s3 + $0x10] sm:$0xff]  ;;  %v686_v42 = vld [vmem:[%s8155_s3 + $0x20] sm:$0xff]  ;;  %v749_v44 = vsel %vm738_vm1, %v685_v41, 0  ;;  %v687_v48 = vld [vmem:[%s8155_s3 + $0x28] sm:$0xff] }
  0x21   :  { %5188 = vmatmul.mubr.f32.vlgmr.msra.gmra.mrb[0].mxu0 %v6824_v25  ;;  %v4635_v25 = vld [vmem:[%s8163_s11 + $0x18] sm:$0xff]  ;;  %v746_v40 = vsel %vm738_vm1, %v684_v37, 0  ;;  %v752_v47 = vsel %vm738_vm1, %v686_v42, 0  ;;  %v7046_v51 = vand.u32 4294901760, %v749_v44  ;;  %v688_v55 = vld [vmem:[%s8155_s3 + $0x30] sm:$0xff] }
  0x22   :  { %5190 = vmatprep.mubr.f32.mxu0 %v6827_v26  ;;  %5994 = vmatpush3.bf16.msra.mxu0 %v6801_v16  ;;  %v4669_v26 = vld [vmem:[#allocation2] sm:$0x1]  ;;  %v7038_v43 = vand.u32 4294901760, %v746_v40  ;;  %v7059_v58 = vand.u32 4294901760, %v752_v47 }
  0x23   :  { %5996 = vmatprep.subr.bf16.mxu0 %v5995_v59  ;;  %1601 = vperm.xlu0 %6677, %v1575_v60  }
  0x24   :  { %1606 = vperm.xlu1 %6678, %v1576_v61   ;;  %v7049_v54 = vsub.f32 %v746_v40, %v7038_v43 }
  0x25   :  { %5191 = vmatmul.mubr.f32.gmra.mrb[2].mxu0 %v6830_v27  ;;  %v682_v27 = vld [vmem:[%s8155_s3] sm:$0xff] }
  0x26   :  { %5197 = vmatprep.mubr.f32.mxu0 %v159_v29  ;;  %v740_v28 = vsel %vm738_vm1, %v682_v27, 0 }
  0x27   :  { %1611 = vperm.xlu0 %6677, %v1577_v62   ;;  %v7010_v29 = vand.u32 4294901760, %v740_v28 }
  0x28   :  { %1616 = vperm.xlu1 %6678, %v1578_v63  }
  0x29   :  { %5198 = vmatmul.mubr.f32.vlgmr.msra.gmra.mrb[0].mxu0 %v169_v32  ;;  %v7013_v30 = vsub.f32 %v740_v28, %v7010_v29 }
  0x2a   :  { %5200 = vmatprep.mubr.f32.mxu0 %v179_v33  ;;  %5998 = vmatpush3.bf16.msra.mxu0 %v5995_v59  ;;  %v755_v59 = vsel %vm738_vm1, %v687_v48, 0 }
  0x2b   :  { %6000 = vmatprep.subr.bf16.mxu0 %v6801_v16  ;;  %1621 = vperm.xlu0 %6677, %v1579_v0   ;;  %v834_v31 = vand.u32 4294901760, %v7013_v30  ;;  %v7063_v0 = vsub.f32 %v749_v44, %v7046_v51 }
  0x2c   :  { %1626 = vperm.xlu1 %6678, %v1580_v1   ;;  %v758_v1 = vsel %vm738_vm1, %v688_v55, 0 }
  0x2d   :  { %5201 = vmatmul.mubr.f32.gmra.mrb[2].mxu0 %v189_v34  ;;  %v835_v32 = vsub.f32 %v7013_v30, %v834_v31  ;;  %v683_v34 = vld [vmem:[%s8155_s3 + $0x8] sm:$0xff] }
  0x2e   :  { %5207 = vmatprep.mubr.f32.mxu0 %v6796_v11  ;;  %v743_v35 = vsel %vm738_vm1, %v683_v34, 0 }
  0x2f   :  { %1631 = vperm.xlu0 %6677, %v1581_v2   ;;  %v836_v33 = vand.u32 4294901760, %v835_v32  ;;  %v7023_v36 = vand.u32 4294901760, %v743_v35  ;;  %v689_v2 = vld [vmem:[%s8155_s3 + $0x38] sm:$0xff] }
  0x30   :  { %1636 = vperm.xlu1 %6678, %v1582_v3  }
  0x31   :  { %5208 = vmatmul.mubr.f32.vlgmr.msra.gmra.mrb[0].mxu0 %v6803_v17  ;;  %5231 = vmatprep.mubr.f32.mxu1 %v836_v33  ;;  %v7029_v39 = vsub.f32 %v743_v35, %v7023_v36 }
  0x32   :  { %5210 = vmatprep.mubr.f32.mxu0 %v6805_v18  ;;  %6002 = vmatpush3.bf16.msra.mxu0 %v6801_v16  ;;  %v2930_v16 = vld [vmem:[%s8160_s8 + $0x30] sm:$0xff] }
  0x33   :  { %1641 = vperm.xlu0 %6677, %v1583_v4   ;;  %v844_v46 = vand.u32 4294901760, %v7029_v39 }
  0x34   :  { %1646 = vperm.xlu1 %6678, %v1584_v5  }
  0x35   :  { %5211 = vmatmul.mubr.f32.gmra.mrb[2].mxu0 %v6807_v19  ;;  %v7057_v57 = vsub.f32 %v7029_v39, %v844_v46 }
  0x36   :  { %5217 = vmatprep.mubr.f32.mxu0 %v6796_v11  ;;  %v2925_v11 = vld [vmem:[%s8160_s8 + $0x8] sm:$0xff] }
  0x37   :  { %1651 = vperm.xlu0 %6677, %v1585_v6   ;;  %v854_v6 = vand.u32 4294901760, %v7049_v54 }
  0x38   :  { %1656 = vperm.xlu1 %6678, %v1586_v7   ;;  %v7070_v7 = vand.u32 4294901760, %v755_v59 }
  0x39   :  { %5218 = vmatmul.mubr.f32.vlgmr.msra.gmra.mrb[0].mxu0 %v6803_v17  ;;  %v2931_v17 = vld [vmem:[%s8160_s8 + $0x38] sm:$0xff] }
  0x3a   :  { %5220 = vmatprep.mubr.f32.mxu0 %v6805_v18  ;;  %v3926_v18 = vld [vmem:[%s8162_s10] sm:$0xff] }
  0x3b   :  { %1661 = vperm.xlu0 %6677, %v1587_v8  }
  0x3c   :  { %1666 = vperm.xlu1 %6678, %v1588_v9  }
  0x3d   :  { %5221 = vmatmul.mubr.f32.gmra.mrb[2].mxu0 %v6807_v19  ;;  %v3927_v19 = vld [vmem:[%s8162_s10 + $0x8] sm:$0xff] }
  0x3f   :  { %2934 = vperm.xlu0 %6677, %v2924_v10   ;;  %v846_v10 = vand.u32 4294901760, %v7057_v57 }
  0x40   :  { %2939 = vperm.xlu1 %6678, %v2925_v11   ;;  %v7074_v11 = vsub.f32 %v752_v47, %v7059_v58 }
  0x42   :  { %v874_v33 = vand.u32 4294901760, %v7074_v11 }
  0x43   :  { %2944 = vperm.xlu0 %6677, %v2926_v12  }
  0x44   :  { %2949 = vperm.xlu1 %6678, %v2927_v13   ;;  %v875_v55 = vsub.f32 %v7074_v11, %v874_v33 }
  0x47   :  { %2954 = vperm.xlu0 %6677, %v2928_v14   ;;  %v7076_v14 = vand.u32 4294901760, %v758_v1 }
  0x48   :  { %2959 = vperm.xlu1 %6678, %v2929_v15   ;;  %v761_v15 = vsel %vm738_vm1, %v689_v2, 0 }
  0x49   :  { %v7089_v27 = vand.u32 4294901760, %v761_v15  ;;  %v7094_v34 = vsub.f32 %v758_v1, %v7076_v14 }
  0x4b   :  { %2964 = vperm.xlu0 %6677, %v2930_v16  }
  0x4c   :  { %2969 = vperm.xlu1 %6678, %v2931_v17  }
  0x4f   :  { %3932 = vperm.xlu0 %6677, %v3926_v18  }
  0x50   :  { %3937 = vperm.xlu1 %6678, %v3927_v19   ;;  %v864_v19 = vand.u32 4294901760, %v7063_v0 }
  0x52   :  { %v865_v44 = vsub.f32 %v7063_v0, %v864_v19 }
  0x53   :  { %3942 = vperm.xlu0 %6677, %v3928_v20  }
  0x54   :  { %3947 = vperm.xlu1 %6678, %v3929_v21  }
  0x57   :  { %4638 = vperm.xlu0 %6677, %v4632_v22   ;;  %v855_v22 = vsub.f32 %v7049_v54, %v854_v6 }
  0x58   :  { %4643 = vperm.xlu1 %6678, %v4633_v23   ;;  %v7086_v23 = vsub.f32 %v755_v59, %v7070_v7 }
  0x5b   :  { %4648 = vperm.xlu0 %6677, %v4634_v24  }
  0x5c   :  { %4653 = vperm.xlu1 %6678, %v4635_v25  }
  0x5f   :  { %4672 = vperm.xlu0 %6677, %v4669_v26  }
  0x85   :  { %v60_v38 = vpop.permute.xlu0 %59  ;;  %v70_v45 = vpop.permute.xlu1 %69 }
  0x89   :  { %v65_v49 = vpop.permute.xlu0 %64  ;;  %v75_v61 = vpop.permute.xlu1 %74 }
 0x10c   :  { %v5219_v50 = vpop.f32.mrb[0].mxu0 }
 0x10d   :  { %v6435_v52 = vadd.f32 %v5219_v50, %v65_v49  ;;  %v656_v53 = vpop.f32.mrb[1].mxu0  ;;  %v7106_v49 = vsub.f32 %v761_v15, %v7089_v27  ;;  %v1561_v15 = vld [vmem:[%s8157_s5 + $0x20] sm:$0xff] }
 0x10e   :  { %v6436_v56 = vadd.f32 %v656_v53, %v60_v38 }
 0x10f   :  { %v679_v60 = vmax.f32 %v6435_v52, 0.0  ;;  %v856_v52 = vand.u32 4294901760, %v855_v22  ;;  %v904_v2 = vand.u32 4294901760, %v7106_v49  ;;  %v1683_v22 = vsel %vm1669_vm2, %v1561_v15, 0 }
 0x110   :  { %v678_v62 = vmax.f32 %v6436_v56, 0.0  ;;  %v5222_v63 = vpop.f32.mrb[2].mxu0  ;;  %v894_v56 = vand.u32 4294901760, %v7094_v34 }
 0x111   :  { %v767_v3 = vand.u32 4294901760, %v679_v60  ;;  %v6437_v4 = vadd.f32 %v5222_v63, %v75_v61  ;;  %v668_v5 = vpop.f32.mrb[3].mxu0 }
 0x112   :  { %v764_v8 = vand.u32 4294901760, %v678_v62  ;;  %v6438_v9 = vadd.f32 %v668_v5, %v70_v45  ;;  %v884_v45 = vand.u32 4294901760, %v7086_v23 }
 0x113   :  { %v921_v12 = vsub.f32 %v679_v60, %v767_v3  ;;  %v681_v13 = vmax.f32 %v6437_v4, 0.0  ;;  %v895_v4 = vsub.f32 %v7094_v34, %v894_v56 }
 0x114   :  { %v7079_v16 = vpack.c.bf16 %v767_v3, %v764_v8  ;;  %v914_v17 = vsub.f32 %v678_v62, %v764_v8  ;;  %v680_v18 = vmax.f32 %v6438_v9, 0.0  ;;  %v866_v62 = vand.u32 4294901760, %v865_v44 }
 0x115   :  { %v922_v20 = vand.u32 4294901760, %v921_v12  ;;  %v773_v21 = vand.u32 4294901760, %v681_v13  ;;  %v885_v1 = vsub.f32 %v7086_v23, %v884_v45  ;;  %v876_v3 = vand.u32 4294901760, %v875_v55 }
 0x116   :  { %v915_v24 = vand.u32 4294901760, %v914_v17  ;;  %v770_v25 = vand.u32 4294901760, %v680_v18  ;;  %6004 = vmatprep.subr.bf16.mxu1 %v7079_v16  ;;  %v6019_v26 = vpack.c.bf16 %v921_v12, %v914_v17  ;;  %v905_v9 = vsub.f32 %v7106_v49, %v904_v2 }
 0x117   :  { %v935_v28 = vsub.f32 %v681_v13, %v773_v21  ;;  %6006 = vmatpush3.bf16.msra.mxu1 %v7079_v16  ;;  %v923_v32 = vsub.f32 %v921_v12, %v922_v20  ;;  %v886_v8 = vand.u32 4294901760, %v885_v1 }
 0x118   :  { %v7096_v35 = vpack.c.bf16 %v773_v21, %v770_v25  ;;  %v928_v37 = vsub.f32 %v680_v18, %v770_v25  ;;  %v916_v38 = vsub.f32 %v914_v17, %v915_v24  ;;  %v7098_v40 = vpack.c.bf16 %v922_v20, %v915_v24  ;;  %v1562_v18 = vld [vmem:[%s8157_s5 + $0x28] sm:$0xff]  ;;  %v706_v20 = vpop.permute.xlu1 %705 }
 0x119   :  { %v936_v41 = vand.u32 4294901760, %v935_v28  ;;  %v924_v42 = vand.u32 4294901760, %v923_v32  ;;  %v906_v12 = vand.u32 4294901760, %v905_v9  ;;  %v1686_v24 = vsel %vm1669_vm2, %v1562_v18, 0  ;;  %v1564_v32 = vld [vmem:[%s8157_s5 + $0x38] sm:$0xff]  ;;  %v1567_v18 = vld [vmem:[%s8157_s5 + $0x50] sm:$0xff] }
 0x11a   :  { %v929_v47 = vand.u32 4294901760, %v928_v37  ;;  %6008 = vmatprep.subr.bf16.mxu1 %v7096_v35  ;;  %v917_v48 = vand.u32 4294901760, %v916_v38  ;;  %v6023_v50 = vpack.c.bf16 %v935_v28, %v928_v37 }
 0x11b   :  { %6010 = vmatpush3.bf16.msra.mxu1 %v7096_v35  ;;  %v937_v53 = vsub.f32 %v935_v28, %v936_v41  ;;  %v7228_v28 = vand.u32 4294901760, %v1683_v22 }
 0x11c   :  { %v6011_v57 = vpack.c.bf16 %v924_v42, %v917_v48  ;;  %v930_v59 = vsub.f32 %v928_v37, %v929_v47  ;;  %v6039_v60 = vpack.c.bf16 %v936_v41, %v929_v47  ;;  %v716_v37 = vpop.permute.xlu1 %715  ;;  %v1692_v42 = vsel %vm1669_vm2, %v1564_v32, 0 }
 0x11d   :  { %v938_v61 = vand.u32 4294901760, %v937_v53  ;;  %v7250_v48 = vsub.f32 %v1683_v22, %v7228_v28  ;;  %v1565_v53 = vld [vmem:[%s8157_s5 + $0x40] sm:$0xff] }
 0x11e   :  { %5232 = vmatmul.mubr.f32.vlgmr.msra.gmra.mrb[0].mxu1 %v846_v10  ;;  %6012 = vmatprep.subr.bf16.mxu1 %v6011_v57  ;;  %v931_v63 = vand.u32 4294901760, %v930_v59  ;;  %v896_v10 = vand.u32 4294901760, %v895_v4  ;;  %v7272_v4 = vsel %vm1669_vm2, %v1565_v53, 0 }
 0x11f   :  { %6014 = vmatpush3.bf16.msra.mxu1 %v6011_v57  ;;  %5234 = vmatprep.mubr.f32.mxu1 %v856_v52  ;;  %v7266_v57 = vand.u32 4294901760, %v1692_v42  ;;  %v7286_v15 = vand.u32 4294901760, %v7272_v4 }
 0x120   :  { %v6015_v5 = vpack.c.bf16 %v938_v61, %v931_v63 }
 0x122   :  { %5235 = vmatmul.mubr.f32.gmra.mrb[2].mxu1 %v866_v62  ;;  %6016 = vmatprep.subr.bf16.mxu1 %v6015_v5 }
 0x123   :  { %6018 = vmatpush3.bf16.msra.mxu1 %v6015_v5  ;;  %5237 = vmatprep.mubr.f32.mxu1 %v876_v3  ;;  %v1833_v3 = vand.u32 4294901760, %v7250_v48  ;;  %v726_v5 = vpop.permute.xlu1 %725 }
 0x124   :  { %6020 = vmatprep.subr.bf16.mxu1 %v6019_v26 }
 0x126   :  { %5238 = vmatmul.mubr.f32.gmra.mrb[4].mxu1 %v886_v8 }
 0x127   :  { %5240 = vmatprep.mubr.f32.mxu1 %v896_v10 }
 0x12a   :  { %5241 = vmatmul.mubr.f32.gmra.mrb[6].mxu1 %v906_v12 }
 0x12b   :  { %5251 = vmatprep.mubr.f32.mxu1 %v7010_v29 }
 0x12e   :  { %5252 = vmatmul.mubr.f32.vlgmr.msra.gmra.mrb[0].mxu1 %v7023_v36 }
 0x12f   :  { %6022 = vmatpush3.bf16.msra.mxu1 %v6019_v26  ;;  %5254 = vmatprep.mubr.f32.mxu1 %v7038_v43 }
 0x130   :  { %6024 = vmatprep.subr.bf16.mxu1 %v6023_v50 }
 0x132   :  { %5255 = vmatmul.mubr.f32.gmra.mrb[2].mxu1 %v7046_v51 }
 0x133   :  { %6026 = vmatpush3.bf16.msra.mxu1 %v6023_v50  ;;  %5257 = vmatprep.mubr.f32.mxu1 %v7059_v58 }
 0x134   :  { %6028 = vmatprep.subr.bf16.mxu1 %v7079_v16 }
 0x136   :  { %5258 = vmatmul.mubr.f32.gmra.mrb[4].mxu1 %v7070_v7 }
 0x137   :  { %5260 = vmatprep.mubr.f32.mxu1 %v7076_v14 }
 0x13a   :  { %5261 = vmatmul.mubr.f32.gmra.mrb[6].mxu1 %v7089_v27 }
 0x13b   :  { %5271 = vmatprep.mubr.f32.mxu1 %v7013_v30  ;;  %v1557_v30 = vld [vmem:[%s8157_s5] sm:$0xff] }
 0x13e   :  { %5272 = vmatmul.mubr.f32.vlgmr.msra.gmra.mrb[0].mxu1 %v7029_v39 }
 0x13f   :  { %6030 = vmatpush3.bf16.msra.mxu1 %v7079_v16  ;;  %5274 = vmatprep.mubr.f32.mxu1 %v7049_v54  ;;  %v1559_v54 = vld [vmem:[%s8157_s5 + $0x10] sm:$0xff] }
 0x140   :  { %6032 = vmatprep.subr.bf16.mxu1 %v7096_v35 }
 0x142   :  { %5275 = vmatmul.mubr.f32.gmra.mrb[2].mxu1 %v7063_v0 }
 0x143   :  { %6034 = vmatpush3.bf16.msra.mxu1 %v7096_v35  ;;  %5277 = vmatprep.mubr.f32.mxu1 %v7074_v11 }
 0x144   :  { %6036 = vmatprep.subr.bf16.mxu1 %v7098_v40 }
 0x146   :  { %5278 = vmatmul.mubr.f32.gmra.mrb[4].mxu1 %v7086_v23  ;;  %v701_v23 = vpop.permute.xlu0 %700 }
 0x147   :  { %5280 = vmatprep.mubr.f32.mxu1 %v7094_v34  ;;  %v7234_v34 = vand.u32 4294901760, %v1686_v24 }
 0x149   :  { %v7258_v52 = vsub.f32 %v1686_v24, %v7234_v34 }
 0x14a   :  { %5281 = vmatmul.mubr.f32.gmra.mrb[6].mxu1 %v7106_v49  ;;  %v711_v44 = vpop.permute.xlu0 %710 }
 0x14b   :  { %5291 = vmatprep.mubr.f32.mxu1 %v834_v31  ;;  %v1843_v12 = vand.u32 4294901760, %v7258_v52 }
 0x14e   :  { %5292 = vmatmul.mubr.f32.vlgmr.msra.gmra.mrb[0].mxu1 %v844_v46 }
 0x14f   :  { %6038 = vmatpush3.bf16.msra.mxu1 %v7098_v40  ;;  %5294 = vmatprep.mubr.f32.mxu1 %v854_v6  ;;  %v1677_v6 = vsel %vm1669_vm2, %v1559_v54, 0  ;;  %v7281_v54 = vsub.f32 %v1692_v42, %v7266_v57 }
 0x150   :  { %6040 = vmatprep.subr.bf16.mxu1 %v6039_v60  ;;  %v7201_v13 = vand.u32 4294901760, %v1677_v6 }
 0x152   :  { %5295 = vmatmul.mubr.f32.gmra.mrb[2].mxu1 %v864_v19  ;;  %v7212_v17 = vsub.f32 %v1677_v6, %v7201_v13  ;;  %v1563_v19 = vld [vmem:[%s8157_s5 + $0x30] sm:$0xff] }
 0x153   :  { %6042 = vmatpush3.bf16.msra.mxu1 %v6039_v60  ;;  %5297 = vmatprep.mubr.f32.mxu1 %v874_v33 }
 0x154   :  { %6044 = vmatprep.subr.bf16.mxu1 %v7079_v16  ;;  %v1813_v26 = vand.u32 4294901760, %v7212_v17 }
 0x156   :  { %5298 = vmatmul.mubr.f32.gmra.mrb[4].mxu1 %v884_v45  ;;  %v7246_v41 = vsub.f32 %v7212_v17, %v1813_v26 }
 0x157   :  { %5300 = vmatprep.mubr.f32.mxu1 %v894_v56 }
 0x158   :  { %v1815_v62 = vand.u32 4294901760, %v7246_v41 }
 0x15a   :  { %5301 = vmatmul.mubr.f32.gmra.mrb[6].mxu1 %v904_v2 }
 0x15b   :  { %5311 = vmatprep.mubr.f32.mxu1 %v7010_v29 }
 0x15e   :  { %5312 = vmatmul.mubr.f32.vlgmr.msra.gmra.mrb[0].mxu1 %v7023_v36 }
 0x15f   :  { %6046 = vmatpush3.bf16.msra.mxu1 %v7079_v16  ;;  %5314 = vmatprep.mubr.f32.mxu1 %v7038_v43 }
 0x160   :  { %6048 = vmatprep.subr.bf16.mxu1 %v7096_v35 }
 0x162   :  { %5315 = vmatmul.mubr.f32.gmra.mrb[2].mxu1 %v7046_v51 }
 0x163   :  { %6050 = vmatpush3.bf16.msra.mxu1 %v7096_v35  ;;  %5317 = vmatprep.mubr.f32.mxu1 %v7059_v58 }
 0x166   :  { %5318 = vmatmul.mubr.f32.gmra.mrb[4].mxu1 %v7070_v7 }
 0x167   :  { %5320 = vmatprep.mubr.f32.mxu1 %v7076_v14 }
 0x16a   :  { %5321 = vmatmul.mubr.f32.gmra.mrb[6].mxu1 %v7089_v27 }
 0x16b   :  { %5331 = vmatprep.mubr.f32.mxu1 %v7010_v29  ;;  %v1671_v29 = vsel %vm1669_vm2, %v1557_v30, 0  ;;  %v1566_v30 = vld [vmem:[%s8157_s5 + $0x48] sm:$0xff] }
 0x16c   :  { %v7177_v31 = vand.u32 4294901760, %v1671_v29  ;;  %v7292_v24 = vsel %vm1669_vm2, %v1566_v30, 0 }
 0x16e   :  { %5332 = vmatmul.mubr.f32.vlgmr.msra.gmra.mrb[0].mxu1 %v7023_v36  ;;  %v7180_v36 = vsub.f32 %v1671_v29, %v7177_v31  ;;  %5399 = vmatprep.mubr.f32.mxu0 %v7177_v31  ;;  %v721_v29 = vpop.permute.xlu0 %720 }
 0x16f   :  { %5334 = vmatprep.mubr.f32.mxu1 %v7038_v43 }
 0x170   :  { %v1793_v39 = vand.u32 4294901760, %v7180_v36 }
 0x172   :  { %5335 = vmatmul.mubr.f32.gmra.mrb[2].mxu1 %v7046_v51  ;;  %v1794_v43 = vsub.f32 %v7180_v36, %v1793_v39  ;;  %v1558_v51 = vld [vmem:[%s8157_s5 + $0x8] sm:$0xff] }
 0x173   :  { %5337 = vmatprep.mubr.f32.mxu1 %v7059_v58  ;;  %v1560_v58 = vld [vmem:[%s8157_s5 + $0x18] sm:$0xff]  ;;  %v1674_v0 = vsel %vm1669_vm2, %v1558_v51, 0 }
 0x174   :  { %v1795_v46 = vand.u32 4294901760, %v1794_v43  ;;  %v7199_v11 = vand.u32 4294901760, %v1674_v0 }
 0x176   :  { %5338 = vmatmul.mubr.f32.gmra.mrb[4].mxu1 %v7070_v7  ;;  %v1680_v7 = vsel %vm1669_vm2, %v1560_v58, 0  ;;  %v7209_v16 = vsub.f32 %v1674_v0, %v7199_v11 }
 0x177   :  { %5340 = vmatprep.mubr.f32.mxu1 %v7076_v14  ;;  %v7203_v14 = vand.u32 4294901760, %v1680_v7 }
 0x178   :  { %v1803_v25 = vand.u32 4294901760, %v7209_v16 }
 0x179   :  { %v7221_v21 = vsub.f32 %v1680_v7, %v7203_v14 }
 0x17a   :  { %5341 = vmatmul.mubr.f32.gmra.mrb[6].mxu1 %v7089_v27  ;;  %v1689_v27 = vsel %vm1669_vm2, %v1563_v19, 0  ;;  %v7241_v40 = vsub.f32 %v7209_v16, %v1803_v25 }
 0x17b   :  { %5359 = vmatprep.mubr.f32.mxu1 %v1795_v46  ;;  %v8166_v33 = vand.u32 4294901760, %v7221_v21  ;;  %v7236_v35 = vand.u32 4294901760, %v1689_v27 }
 0x17c   :  { %v1805_v61 = vand.u32 4294901760, %v7241_v40 }
 0x17d   :  { %v7255_v50 = vsub.f32 %v7221_v21, %v8166_v33  ;;  %v7264_v56 = vsub.f32 %v1689_v27, %v7236_v35 }
 0x17f   :  { %v1825_v10 = vand.u32 4294901760, %v7255_v50  ;;  %v8167_v51 = vand.u32 4294901760, %v7264_v56 }
 0x241   :  { %v5333_v38 = vpop.f32.mrb[0].mxu1 }
 0x242   :  { %v6439_v45 = vadd.f32 %v5333_v38, %v706_v20  ;;  %v1503_v47 = vpop.f32.mrb[1].mxu1 }
 0x243   :  { %v6440_v49 = vadd.f32 %v1503_v47, %v701_v23  ;;  %v7299_v47 = vsel %vm1669_vm2, %v1567_v18, 0 }
 0x244   :  { %v1550_v55 = vmax.f32 %v6439_v45, 0.0 }
 0x245   :  { %v1549_v59 = vmax.f32 %v6440_v49, 0.0  ;;  %v5336_v60 = vpop.f32.mrb[2].mxu1  ;;  %v736_v49 = vpop.permute.xlu1 %735 }
 0x246   :  { %v1722_v63 = vand.u32 4294901760, %v1550_v55  ;;  %v6441_v1 = vadd.f32 %v5336_v60, %v716_v37  ;;  %v1515_v2 = vpop.f32.mrb[3].mxu1 }
 0x247   :  { %v1719_v8 = vand.u32 4294901760, %v1549_v59  ;;  %v6442_v9 = vadd.f32 %v1515_v2, %v711_v44 }
 0x248   :  { %v1960_v43 = vsub.f32 %v1550_v55, %v1722_v63  ;;  %v1552_v46 = vmax.f32 %v6441_v1, 0.0  ;;  %v731_v1 = vpop.permute.xlu0 %730 }
 0x249   :  { %v7283_v58 = vpack.c.bf16 %v1722_v63, %v1719_v8  ;;  %v1953_v0 = vsub.f32 %v1549_v59, %v1719_v8  ;;  %v1551_v6 = vmax.f32 %v6442_v9, 0.0  ;;  %v5339_v7 = vpop.f32.mrb[4].mxu1 }
 0x24a   :  { %v1961_v19 = vand.u32 4294901760, %v1960_v43  ;;  %v1728_v20 = vand.u32 4294901760, %v1552_v46  ;;  %v6443_v22 = vadd.f32 %v5339_v7, %v726_v5  ;;  %v1527_v23 = vpop.f32.mrb[5].mxu1 }
 0x24b   :  { %v1954_v27 = vand.u32 4294901760, %v1953_v0  ;;  %v1725_v32 = vand.u32 4294901760, %v1551_v6  ;;  %v6444_v37 = vadd.f32 %v1527_v23, %v721_v29  ;;  %6052 = vmatprep.subr.bf16.mxu1 %v7283_v58  ;;  %v7295_v38 = vpack.c.bf16 %v1960_v43, %v1953_v0 }
 0x24c   :  { %v1974_v42 = vsub.f32 %v1552_v46, %v1728_v20  ;;  %v1554_v44 = vmax.f32 %v6443_v22, 0.0  ;;  %6054 = vmatpush3.bf16.msra.mxu1 %v7283_v58  ;;  %v1962_v45 = vsub.f32 %v1960_v43, %v1961_v19 }
 0x24d   :  { %v7301_v53 = vpack.c.bf16 %v1728_v20, %v1725_v32  ;;  %v1967_v55 = vsub.f32 %v1551_v6, %v1725_v32  ;;  %v1553_v59 = vmax.f32 %v6444_v37, 0.0  ;;  %v5342_v60 = vpop.f32.mrb[6].mxu1  ;;  %v1955_v63 = vsub.f32 %v1953_v0, %v1954_v27 }
 0x24e   :  { %v1975_v2 = vand.u32 4294901760, %v1974_v42  ;;  %v1734_v5 = vand.u32 4294901760, %v1554_v44  ;;  %v6445_v8 = vadd.f32 %v5342_v60, %v736_v49  ;;  %v1539_v9 = vpop.f32.mrb[7].mxu1  ;;  %v1963_v30 = vand.u32 4294901760, %v1962_v45 }
 0x24f   :  { %v1968_v29 = vand.u32 4294901760, %v1967_v55  ;;  %v1731_v46 = vand.u32 4294901760, %v1553_v59  ;;  %v6446_v7 = vadd.f32 %v1539_v9, %v731_v1  ;;  %6056 = vmatprep.subr.bf16.mxu1 %v7301_v53  ;;  %v1956_v43 = vand.u32 4294901760, %v1955_v63 }
 0x250   :  { %v1988_v18 = vsub.f32 %v1554_v44, %v1734_v5  ;;  %v1556_v22 = vmax.f32 %v6445_v8, 0.0  ;;  %6058 = vmatpush3.bf16.msra.mxu1 %v7301_v53  ;;  %v1976_v6 = vsub.f32 %v1974_v42, %v1975_v2  ;;  %v7305_v20 = vpack.c.bf16 %v1974_v42, %v1967_v55 }
 0x251   :  { %v7307_v0 = vpack.c.bf16 %v1734_v5, %v1731_v46  ;;  %v1981_v23 = vsub.f32 %v1553_v59, %v1731_v46  ;;  %v1555_v32 = vmax.f32 %v6446_v7, 0.0  ;;  %v6067_v37 = vpack.c.bf16 %v1963_v30, %v1956_v43  ;;  %v1568_v7 = vld [vmem:[%s8157_s5 + $0x58] sm:$0xff] }
 0x252   :  { %v1989_v49 = vand.u32 4294901760, %v1988_v18  ;;  %v1740_v45 = vand.u32 4294901760, %v1556_v22  ;;  %v1969_v60 = vsub.f32 %v1967_v55, %v1968_v29  ;;  %v1977_v33 = vand.u32 4294901760, %v1976_v6 }
 0x253   :  { %v1982_v1 = vand.u32 4294901760, %v1981_v23  ;;  %v1737_v9 = vand.u32 4294901760, %v1555_v32  ;;  %6060 = vmatprep.subr.bf16.mxu1 %v7307_v0  ;;  %6068 = vmatprep.subr.bf16.mxu0 %v6067_v37  ;;  %v7310_v44 = vpack.c.bf16 %v1988_v18, %v1981_v23  ;;  %v7312_v63 = vpack.c.bf16 %v1961_v19, %v1954_v27 }
 0x254   :  { %v2002_v42 = vsub.f32 %v1556_v22, %v1740_v45  ;;  %6062 = vmatpush3.bf16.msra.mxu1 %v7307_v0  ;;  %6070 = vmatpush3.bf16.msra.mxu0 %v6067_v37  ;;  %v1970_v59 = vand.u32 4294901760, %v1969_v60  ;;  %v1990_v5 = vsub.f32 %v1988_v18, %v1989_v49  ;;  %v7315_v8 = vpack.c.bf16 %v1975_v2, %v1968_v29  ;;  %v1569_v2 = vld [vmem:[%s8157_s5 + $0x60] sm:$0xff] }
 0x255   :  { %v7317_v30 = vpack.c.bf16 %v1740_v45, %v1737_v9  ;;  %v1995_v55 = vsub.f32 %v1555_v32, %v1737_v9  ;;  %v1983_v46 = vsub.f32 %v1981_v23, %v1982_v1  ;;  %v7322_v43 = vpack.c.bf16 %v1989_v49, %v1982_v1  ;;  %v1570_v9 = vld [vmem:[%s8157_s5 + $0x68] sm:$0xff] }
 0x256   :  { %v2003_v19 = vand.u32 4294901760, %v2002_v42  ;;  %v6071_v27 = vpack.c.bf16 %v1977_v33, %v1970_v59  ;;  %v1991_v22 = vand.u32 4294901760, %v1990_v5  ;;  %v7325_v6 = vand.u32 4294901760, %v7292_v24 }
 0x257   :  { %v1996_v29 = vand.u32 4294901760, %v1995_v55  ;;  %6064 = vmatprep.subr.bf16.mxu1 %v7317_v30  ;;  %v1984_v18 = vand.u32 4294901760, %v1983_v46  ;;  %v7333_v23 = vsub.f32 %v7272_v4, %v7286_v15  ;;  %v7335_v32 = vpack.c.bf16 %v2002_v42, %v1995_v55 }
 0x258   :  { %6072 = vmatprep.subr.bf16.mxu0 %v6071_v27  ;;  %6066 = vmatpush3.bf16.msra.mxu1 %v7317_v30  ;;  %v2004_v33 = vsub.f32 %v2002_v42, %v2003_v19  ;;  %v1834_v37 = vsub.f32 %v7250_v48, %v1833_v3  ;;  %v7342_v49 = vand.u32 4294901760, %v7299_v47  ;;  %v1704_v45 = vsel %vm1669_vm2, %v1568_v7, 0 }
 0x259   :  { %6074 = vmatpush3.bf16.msra.mxu0 %v6071_v27  ;;  %v6075_v60 = vpack.c.bf16 %v1991_v22, %v1984_v18  ;;  %v1997_v1 = vsub.f32 %v1995_v55, %v1996_v29  ;;  %v1707_v4 = vsel %vm1669_vm2, %v1569_v2, 0  ;;  %v7349_v59 = vpack.c.bf16 %v2003_v19, %v1996_v29  ;;  %v1571_v55 = vld [vmem:[%s8157_s5 + $0x70] sm:$0xff] }
 0x25a   :  { %v2005_v42 = vand.u32 4294901760, %v2004_v33  ;;  %v1844_v5 = vsub.f32 %v7258_v52, %v1843_v12  ;;  %v1854_v46 = vsub.f32 %v7264_v56, %v8167_v51  ;;  %v1863_v7 = vand.u32 4294901760, %v7281_v54 }
 0x25b   :  { %5360 = vmatmul.mubr.f32.vlgmr.msra.gmra.mrb[8].mxu1 %v1805_v61  ;;  %6076 = vmatprep.subr.bf16.mxu0 %v6075_v60  ;;  %v1998_v19 = vand.u32 4294901760, %v1997_v1  ;;  %v1873_v27 = vand.u32 4294901760, %v7333_v23  ;;  %v7366_v22 = vsub.f32 %v7292_v24, %v7325_v6  ;;  %v7368_v2 = vand.u32 4294901760, %v1704_v45  ;;  %v1572_v24 = vld [vmem:[%s8157_s5 + $0x78] sm:$0xff] }
 0x25c   :  { %5362 = vmatprep.mubr.f32.mxu1 %v1815_v62  ;;  %v1835_v29 = vand.u32 4294901760, %v1834_v37  ;;  %v7374_v18 = vsub.f32 %v7299_v47, %v7342_v49  ;;  %v7376_v40 = vand.u32 4294901760, %v1707_v4  ;;  %v1710_v61 = vsel %vm1669_vm2, %v1570_v9, 0 }
 0x25d   :  { %6078 = vmatpush3.bf16.msra.mxu0 %v6075_v60  ;;  %v6079_v33 = vpack.c.bf16 %v2005_v42, %v1998_v19  ;;  %v1713_v1 = vsel %vm1669_vm2, %v1571_v55, 0  ;;  %v1845_v51 = vand.u32 4294901760, %v1844_v5  ;;  %v1855_v41 = vand.u32 4294901760, %v1854_v46 }
 0x25e   :  { %v1864_v62 = vsub.f32 %v7281_v54, %v1863_v7  ;;  %v1874_v47 = vsub.f32 %v7333_v23, %v1873_v27  ;;  %v1883_v37 = vand.u32 4294901760, %v7366_v22  ;;  %v7393_v60 = vsub.f32 %v1704_v45, %v7368_v2 }
 0x25f   :  { %5363 = vmatmul.mubr.f32.gmra.mrb[10].mxu1 %v1825_v10  ;;  %6080 = vmatprep.subr.bf16.mxu0 %v6079_v33  ;;  %v7395_v9 = vand.u32 4294901760, %v1710_v61  ;;  %v1893_v42 = vand.u32 4294901760, %v7374_v18  ;;  %v7399_v5 = vsub.f32 %v1707_v4, %v7376_v40  ;;  %v7401_v50 = vand.u32 4294901760, %v1713_v1 }
 0x260   :  { %5365 = vmatprep.mubr.f32.mxu1 %v1835_v29  ;;  %v1716_v10 = vsel %vm1669_vm2, %v1572_v24, 0  ;;  %v1865_v46 = vand.u32 4294901760, %v1864_v62  ;;  %v1884_v45 = vsub.f32 %v7366_v22, %v1883_v37  ;;  %v1903_v55 = vand.u32 4294901760, %v7393_v60 }
 0x261   :  { %6082 = vmatpush3.bf16.msra.mxu0 %v6079_v33  ;;  %v7410_v19 = vsub.f32 %v1710_v61, %v7395_v9  ;;  %v7412_v4 = vand.u32 4294901760, %v1716_v10  ;;  %v1875_v29 = vand.u32 4294901760, %v1874_v47  ;;  %v1894_v33 = vsub.f32 %v7374_v18, %v1893_v42 }
 0x262   :  { %6084 = vmatprep.subr.bf16.mxu0 %v7295_v38  ;;  %v7420_v24 = vsub.f32 %v1713_v1, %v7401_v50  ;;  %v1885_v61 = vand.u32 4294901760, %v1884_v45 }
 0x263   :  { %5366 = vmatmul.mubr.f32.gmra.mrb[12].mxu1 %v1845_v51  ;;  %v1913_v51 = vand.u32 4294901760, %v7399_v5  ;;  %v1923_v62 = vand.u32 4294901760, %v7410_v19  ;;  %v7430_v47 = vsub.f32 %v1716_v10, %v7412_v4  ;;  %v1895_v1 = vand.u32 4294901760, %v1894_v33 }
 0x264   :  { %5400 = vmatmul.mubr.f32.vlgmr.msra.gmra.mrb[4].mxu0 %v7199_v11  ;;  %5368 = vmatprep.mubr.f32.mxu1 %v1855_v41  ;;  %v1904_v41 = vsub.f32 %v7393_v60, %v1903_v55 }
 0x265   :  { %6086 = vmatpush3.bf16.msra.mxu0 %v7295_v38  ;;  %5402 = vmatprep.mubr.f32.mxu0 %v7201_v13  ;;  %v1914_v38 = vsub.f32 %v7399_v5, %v1913_v51  ;;  %v1924_v10 = vsub.f32 %v7410_v19, %v1923_v62 }
 0x266   :  { %6088 = vmatprep.subr.bf16.mxu0 %v7305_v20  ;;  %v1905_v45 = vand.u32 4294901760, %v1904_v41 }
 0x267   :  { %5369 = vmatmul.mubr.f32.gmra.mrb[14].mxu1 %v1865_v46  ;;  %v1933_v46 = vand.u32 4294901760, %v7420_v24  ;;  %v1915_v33 = vand.u32 4294901760, %v1914_v38 }
 0x268   :  { %5403 = vmatmul.mubr.f32.gmra.mrb[6].mxu0 %v7203_v14  ;;  %5371 = vmatprep.mubr.f32.mxu1 %v1875_v29  ;;  %v1943_v29 = vand.u32 4294901760, %v7430_v47 }
 0x269   :  { %6090 = vmatpush3.bf16.msra.mxu0 %v7305_v20  ;;  %5405 = vmatprep.mubr.f32.mxu0 %v7228_v28  ;;  %v1934_v20 = vsub.f32 %v7420_v24, %v1933_v46 }
 0x26a   :  { %6092 = vmatprep.subr.bf16.mxu0 %v7310_v44  ;;  %v1944_v41 = vsub.f32 %v7430_v47, %v1943_v29 }
 0x26b   :  { %5372 = vmatmul.mubr.f32.gmra.mrb[16].mxu1 %v1885_v61  ;;  %v1925_v61 = vand.u32 4294901760, %v1924_v10 }
 0x26c   :  { %5406 = vmatmul.mubr.f32.gmra.mrb[8].mxu0 %v7234_v34  ;;  %5374 = vmatprep.mubr.f32.mxu1 %v1895_v1  ;;  %v1935_v1 = vand.u32 4294901760, %v1934_v20 }
 0x26d   :  { %6094 = vmatpush3.bf16.msra.mxu0 %v7310_v44  ;;  %5408 = vmatprep.mubr.f32.mxu0 %v7236_v35  ;;  %v1945_v44 = vand.u32 4294901760, %v1944_v41 }
 0x26e   :  { %6096 = vmatprep.subr.bf16.mxu0 %v7335_v32 }
 0x26f   :  { %5375 = vmatmul.mubr.f32.gmra.mrb[18].mxu1 %v1905_v45 }
 0x270   :  { %5409 = vmatmul.mubr.f32.gmra.mrb[10].mxu0 %v7266_v57  ;;  %5377 = vmatprep.mubr.f32.mxu1 %v1915_v33 }
 0x271   :  { %6098 = vmatpush3.bf16.msra.mxu0 %v7335_v32  ;;  %5411 = vmatprep.mubr.f32.mxu0 %v7286_v15  ;;  %v8203_v32 = vand.u32 4294901760, %v7221_v21 }
 0x272   :  { %6100 = vmatprep.subr.bf16.mxu0 %v7283_v58 }
 0x273   :  { %5378 = vmatmul.mubr.f32.gmra.mrb[20].mxu1 %v1925_v61 }
 0x274   :  { %5412 = vmatmul.mubr.f32.gmra.mrb[12].mxu0 %v7325_v6  ;;  %5380 = vmatprep.mubr.f32.mxu1 %v1935_v1 }
 0x275   :  { %5414 = vmatprep.mubr.f32.mxu0 %v7342_v49 }
 0x277   :  { %5381 = vmatmul.mubr.f32.gmra.mrb[22].mxu1 %v1945_v44 }
 0x278   :  { %5415 = vmatmul.mubr.f32.gmra.mrb[14].mxu0 %v7368_v2 }
 0x279   :  { %5417 = vmatprep.mubr.f32.mxu0 %v7376_v40 }
 0x27c   :  { %5418 = vmatmul.mubr.f32.gmra.mrb[16].mxu0 %v7395_v9 }
 0x27d   :  { %5420 = vmatprep.mubr.f32.mxu0 %v7401_v50 }
 0x280   :  { %5421 = vmatmul.mubr.f32.gmra.mrb[18].mxu0 %v7412_v4 }
 0x281   :  { %5439 = vmatprep.mubr.f32.mxu0 %v7180_v36  ;;  %v8204_v36 = vand.u32 4294901760, %v7264_v56 }
 0x284   :  { %5440 = vmatmul.mubr.f32.vlgmr.msra.gmra.mrb[4].mxu0 %v7209_v16 }
 0x285   :  { %6102 = vmatpush3.bf16.msra.mxu0 %v7283_v58  ;;  %5442 = vmatprep.mubr.f32.mxu0 %v7212_v17 }
 0x286   :  { %6104 = vmatprep.subr.bf16.mxu0 %v7301_v53 }
 0x288   :  { %5443 = vmatmul.mubr.f32.gmra.mrb[6].mxu0 %v7221_v21 }
 0x289   :  { %6106 = vmatpush3.bf16.msra.mxu0 %v7301_v53  ;;  %5445 = vmatprep.mubr.f32.mxu0 %v7250_v48 }
 0x28a   :  { %6108 = vmatprep.subr.bf16.mxu0 %v7307_v0 }
 0x28c   :  { %5446 = vmatmul.mubr.f32.gmra.mrb[8].mxu0 %v7258_v52 }
 0x28d   :  { %6110 = vmatpush3.bf16.msra.mxu0 %v7307_v0  ;;  %5448 = vmatprep.mubr.f32.mxu0 %v7264_v56 }
 0x28e   :  { %6112 = vmatprep.subr.bf16.mxu0 %v7317_v30 }
 0x290   :  { %5449 = vmatmul.mubr.f32.gmra.mrb[10].mxu0 %v7281_v54 }
 0x291   :  { %6114 = vmatpush3.bf16.msra.mxu0 %v7317_v30  ;;  %5451 = vmatprep.mubr.f32.mxu0 %v7333_v23 }
 0x292   :  { %6116 = vmatprep.subr.bf16.mxu0 %v7312_v63 }
 0x294   :  { %5452 = vmatmul.mubr.f32.gmra.mrb[12].mxu0 %v7366_v22 }
 0x295   :  { %5454 = vmatprep.mubr.f32.mxu0 %v7374_v18 }
 0x298   :  { %5455 = vmatmul.mubr.f32.gmra.mrb[14].mxu0 %v7393_v60 }
 0x299   :  { %5457 = vmatprep.mubr.f32.mxu0 %v7399_v5 }
 0x29c   :  { %5458 = vmatmul.mubr.f32.gmra.mrb[16].mxu0 %v7410_v19 }
 0x29d   :  { %5460 = vmatprep.mubr.f32.mxu0 %v7420_v24 }
 0x2a0   :  { %5461 = vmatmul.mubr.f32.gmra.mrb[18].mxu0 %v7430_v47 }
 0x2a1   :  { %5479 = vmatprep.mubr.f32.mxu0 %v1793_v39 }
 0x2a4   :  { %5480 = vmatmul.mubr.f32.vlgmr.msra.gmra.mrb[4].mxu0 %v1803_v25 }
 0x2a5   :  { %6118 = vmatpush3.bf16.msra.mxu0 %v7312_v63  ;;  %5482 = vmatprep.mubr.f32.mxu0 %v1813_v26 }
 0x2a6   :  { %6120 = vmatprep.subr.bf16.mxu0 %v7315_v8 }
 0x2a8   :  { %5483 = vmatmul.mubr.f32.gmra.mrb[6].mxu0 %v8203_v32 }
 0x2a9   :  { %6122 = vmatpush3.bf16.msra.mxu0 %v7315_v8  ;;  %5485 = vmatprep.mubr.f32.mxu0 %v1833_v3 }
 0x2aa   :  { %6124 = vmatprep.subr.bf16.mxu0 %v7322_v43 }
 0x2ac   :  { %5486 = vmatmul.mubr.f32.gmra.mrb[8].mxu0 %v1843_v12 }
 0x2ad   :  { %6126 = vmatpush3.bf16.msra.mxu0 %v7322_v43  ;;  %5488 = vmatprep.mubr.f32.mxu0 %v8204_v36  ;;  %v2922_v36 = vld [vmem:[%s8159_s7 + $0x30] sm:$0xff] }
 0x2ae   :  { %6128 = vmatprep.subr.bf16.mxu0 %v7349_v59 }
 0x2b0   :  { %5489 = vmatmul.mubr.f32.gmra.mrb[10].mxu0 %v1863_v7  ;;  %v2917_v7 = vld [vmem:[%s8159_s7 + $0x8] sm:$0xff] }
 0x2b1   :  { %6130 = vmatpush3.bf16.msra.mxu0 %v7349_v59  ;;  %5491 = vmatprep.mubr.f32.mxu0 %v1873_v27  ;;  %v2918_v27 = vld [vmem:[%s8159_s7 + $0x10] sm:$0xff]  ;;  %v7592_v22 = vand.u32 4294901760, %v2917_v7 }
 0x2b2   :  { %6132 = vmatprep.subr.bf16.mxu0 %v7283_v58 }
 0x2b3   :  { %v7600_v60 = vsub.f32 %v2917_v7, %v7592_v22 }
 0x2b4   :  { %5492 = vmatmul.mubr.f32.gmra.mrb[12].mxu0 %v1883_v37  ;;  %v2919_v37 = vld [vmem:[%s8159_s7 + $0x18] sm:$0xff] }
 0x2b5   :  { %5494 = vmatprep.mubr.f32.mxu0 %v1893_v42  ;;  %8205 = vst [vmem:[#allocation6_spill] sm:$0xff] %v7600_v60  ;;  %v7608_v5 = vand.u32 4294901760, %v2919_v37 }
 0x2b7   :  { %v7618_v45 = vsub.f32 %v2919_v37, %v7608_v5 }
 0x2b8   :  { %5495 = vmatmul.mubr.f32.gmra.mrb[14].mxu0 %v1903_v55  ;;  %v2921_v55 = vld [vmem:[%s8159_s7 + $0x28] sm:$0xff] }
 0x2b9   :  { %5497 = vmatprep.mubr.f32.mxu0 %v1913_v51  ;;  %8207 = vst [vmem:[#allocation8_spill] sm:$0xff] %v7618_v45  ;;  %v7622_v20 = vand.u32 4294901760, %v2921_v55 }
 0x2bc   :  { %5498 = vmatmul.mubr.f32.gmra.mrb[16].mxu0 %v1923_v62  ;;  %v8171_v62 = vand.u32 4294901760, %v7600_v60 }
 0x2bd   :  { %5500 = vmatprep.mubr.f32.mxu0 %v1933_v46 }
 0x2c0   :  { %5501 = vmatmul.mubr.f32.gmra.mrb[18].mxu0 %v1943_v29 }
 0x2c1   :  { %5519 = vmatprep.mubr.f32.mxu0 %v7177_v31 }
 0x2c4   :  { %5520 = vmatmul.mubr.f32.vlgmr.msra.gmra.mrb[4].mxu0 %v7199_v11 }
 0x2c5   :  { %6134 = vmatpush3.bf16.msra.mxu0 %v7283_v58  ;;  %5522 = vmatprep.mubr.f32.mxu0 %v7201_v13 }
 0x2c6   :  { %6136 = vmatprep.subr.bf16.mxu0 %v7301_v53 }
 0x2c8   :  { %5523 = vmatmul.mubr.f32.gmra.mrb[6].mxu0 %v7203_v14 }
 0x2c9   :  { %6138 = vmatpush3.bf16.msra.mxu0 %v7301_v53  ;;  %5525 = vmatprep.mubr.f32.mxu0 %v7228_v28  ;;  %v1592_v53 = vpop.permute.xlu0 %1591 }
 0x2ca   :  { %6140 = vmatprep.subr.bf16.mxu0 %v7307_v0 }
 0x2cc   :  { %5526 = vmatmul.mubr.f32.gmra.mrb[8].mxu0 %v7234_v34 }
 0x2cd   :  { %6142 = vmatpush3.bf16.msra.mxu0 %v7307_v0  ;;  %5528 = vmatprep.mubr.f32.mxu0 %v7236_v35  ;;  %v1597_v0 = vpop.permute.xlu1 %1596  ;;  %v1602_v63 = vpop.permute.xlu0 %1601 }
 0x2ce   :  { %6144 = vmatprep.subr.bf16.mxu0 %v7317_v30 }
 0x2d0   :  { %5529 = vmatmul.mubr.f32.gmra.mrb[10].mxu0 %v7266_v57 }
 0x2d1   :  { %6146 = vmatpush3.bf16.msra.mxu0 %v7317_v30  ;;  %5531 = vmatprep.mubr.f32.mxu0 %v7286_v15  ;;  %v1607_v8 = vpop.permute.xlu1 %1606  ;;  %v1612_v30 = vpop.permute.xlu0 %1611 }
 0x2d4   :  { %5532 = vmatmul.mubr.f32.gmra.mrb[12].mxu0 %v7325_v6 }
 0x2d5   :  { %5534 = vmatprep.mubr.f32.mxu0 %v7342_v49  ;;  %v1617_v43 = vpop.permute.xlu1 %1616 }
 0x2d8   :  { %5535 = vmatmul.mubr.f32.gmra.mrb[14].mxu0 %v7368_v2 }
 0x2d9   :  { %5537 = vmatprep.mubr.f32.mxu0 %v7376_v40  ;;  %v1627_v23 = vpop.permute.xlu1 %1626 }
 0x2dc   :  { %5538 = vmatmul.mubr.f32.gmra.mrb[16].mxu0 %v7395_v9 }
 0x2dd   :  { %5540 = vmatprep.mubr.f32.mxu0 %v7401_v50  ;;  %v1637_v59 = vpop.permute.xlu1 %1636 }
 0x2e0   :  { %5541 = vmatmul.mubr.f32.gmra.mrb[18].mxu0 %v7412_v4 }
 0x2e1   :  { %5559 = vmatprep.mubr.f32.mxu0 %v7177_v31 }
 0x2e4   :  { %5560 = vmatmul.mubr.f32.vlgmr.msra.gmra.mrb[4].mxu0 %v7199_v11 }
 0x2e5   :  { %5562 = vmatprep.mubr.f32.mxu0 %v7201_v13 }
 0x2e8   :  { %5563 = vmatmul.mubr.f32.gmra.mrb[6].mxu0 %v7203_v14 }
 0x2e9   :  { %5565 = vmatprep.mubr.f32.mxu0 %v7228_v28 }
 0x2ec   :  { %5566 = vmatmul.mubr.f32.gmra.mrb[8].mxu0 %v7234_v34 }
 0x2ed   :  { %5568 = vmatprep.mubr.f32.mxu0 %v7236_v35 }
 0x2f0   :  { %5569 = vmatmul.mubr.f32.gmra.mrb[10].mxu0 %v7266_v57  ;;  %v2916_v57 = vld [vmem:[%s8159_s7] sm:$0xff] }
 0x2f1   :  { %5571 = vmatprep.mubr.f32.mxu0 %v7286_v15  ;;  %v7577_v3 = vand.u32 4294901760, %v2916_v57 }
 0x2f3   :  { %v7580_v12 = vsub.f32 %v2916_v57, %v7577_v3 }
 0x2f4   :  { %5572 = vmatmul.mubr.f32.gmra.mrb[12].mxu0 %v7325_v6  ;;  %v1622_v6 = vpop.permute.xlu0 %1621 }
 0x2f5   :  { %5574 = vmatprep.mubr.f32.mxu0 %v7342_v49  ;;  %v8172_v54 = vand.u32 4294901760, %v7580_v12 }
 0x2f7   :  { %v3056_v58 = vsub.f32 %v7580_v12, %v8172_v54 }
 0x2f8   :  { %5575 = vmatmul.mubr.f32.gmra.mrb[14].mxu0 %v7368_v2  ;;  %v1632_v49 = vpop.permute.xlu0 %1631  ;;  %v7594_v2 = vand.u32 4294901760, %v2918_v27 }
 0x2f9   :  { %5577 = vmatprep.mubr.f32.mxu0 %v7376_v40  ;;  %v3057_v15 = vand.u32 4294901760, %v3056_v58  ;;  %v1647_v40 = vpop.permute.xlu1 %1646 }
 0x2fa   :  { %v7606_v42 = vsub.f32 %v2918_v27, %v7594_v2 }
 0x2fb   :  { %5615 = vmatprep.mubr.f32.mxu1 %v3057_v15  ;;  %v7662_v15 = vand.u32 4294901760, %v2922_v36 }
 0x2fc   :  { %5578 = vmatmul.mubr.f32.gmra.mrb[16].mxu0 %v7395_v9  ;;  %v1642_v18 = vpop.permute.xlu0 %1641  ;;  %v2920_v9 = vld [vmem:[%s8159_s7 + $0x20] sm:$0xff]  ;;  %8206 = vst [vmem:[#allocation7_spill] sm:$0xff] %v7606_v42  ;;  %v8170_v46 = vand.u32 4294901760, %v7606_v42 }
 0x2fd   :  { %5580 = vmatprep.mubr.f32.mxu0 %v7401_v50  ;;  %v7610_v50 = vand.u32 4294901760, %v2920_v9  ;;  %v7684_v37 = vsub.f32 %v2922_v36, %v7662_v15 }
 0x2ff   :  { %v7631_v32 = vsub.f32 %v2920_v9, %v7610_v50 }
 0x300   :  { %5581 = vmatmul.mubr.f32.gmra.mrb[18].mxu0 %v7412_v4  ;;  %v1652_v19 = vpop.permute.xlu0 %1651  ;;  %v1657_v4 = vpop.permute.xlu1 %1656 }
 0x301   :  { %8208 = vst [vmem:[#allocation9_spill] sm:$0xff] %v7631_v32 }
 0x32e   :  { %v5361_v31 = vpop.f32.mrb[8].mxu1 }
 0x32f   :  { %v1797_v39 = vpop.f32.mrb[9].mxu1  ;;  %v1808_v51 = vadd.f32 %v5361_v31, %v1597_v0 }
 0x330   :  { %v1798_v24 = vadd.f32 %v1797_v39, %v1592_v53 }
 0x332   :  { %v5364_v11 = vpop.f32.mrb[10].mxu1 }
 0x333   :  { %v1817_v13 = vpop.f32.mrb[11].mxu1  ;;  %v1828_v47 = vadd.f32 %v5364_v11, %v1607_v8 }
 0x334   :  { %v1818_v38 = vadd.f32 %v1817_v13, %v1602_v63 }
 0x336   :  { %v5367_v14 = vpop.f32.mrb[12].mxu1 }
 0x337   :  { %v1837_v16 = vpop.f32.mrb[13].mxu1  ;;  %v1848_v10 = vadd.f32 %v5367_v14, %v1617_v43  ;;  %v7643_v14 = vsub.f32 %v7600_v60, %v8171_v62 }
 0x338   :  { %v1838_v29 = vadd.f32 %v1837_v16, %v1612_v30  ;;  %v8168_v30 = vand.u32 4294901760, %v7631_v32 }
 0x33a   :  { %v5370_v17 = vpop.f32.mrb[14].mxu1 }
 0x33b   :  { %v1857_v21 = vpop.f32.mrb[15].mxu1  ;;  %v7620_v33 = vadd.f32 %v5370_v17, %v1627_v23 }
 0x33c   :  { %v7624_v61 = vadd.f32 %v1857_v21, %v1622_v6  ;;  %v7650_v21 = vsub.f32 %v7606_v42, %v8170_v46 }
 0x33e   :  { %v5373_v25 = vpop.f32.mrb[16].mxu1 }
 0x33f   :  { %v1877_v26 = vpop.f32.mrb[17].mxu1  ;;  %v7626_v41 = vadd.f32 %v5373_v25, %v1637_v59  ;;  %v8169_v25 = vand.u32 4294901760, %v7618_v45 }
 0x340   :  { %v7628_v1 = vadd.f32 %v1877_v26, %v1632_v49  ;;  %v2923_v26 = vld [vmem:[%s8159_s7 + $0x38] sm:$0xff] }
 0x341   :  { %v7672_v49 = vand.u32 4294901760, %v2923_v26 }
 0x342   :  { %v5376_v28 = vpop.f32.mrb[18].mxu1 }
 0x343   :  { %v1897_v34 = vpop.f32.mrb[19].mxu1  ;;  %v7636_v31 = vadd.f32 %v5376_v28, %v1647_v40  ;;  %v1662_v28 = vpop.permute.xlu0 %1661 }
 0x344   :  { %v7638_v39 = vadd.f32 %v1897_v34, %v1642_v18  ;;  %v1667_v34 = vpop.permute.xlu1 %1666 }
 0x346   :  { %v5379_v35 = vpop.f32.mrb[20].mxu1 }
 0x347   :  { %v7568_v48 = vpop.f32.mrb[21].mxu1  ;;  %v7645_v16 = vadd.f32 %v5379_v35, %v1657_v4  ;;  %v7660_v35 = vsub.f32 %v2921_v55, %v7622_v20 }
 0x348   :  { %v7657_v57 = vadd.f32 %v7568_v48, %v1652_v19 }
 0x34a   :  { %v7570_v52 = vpop.f32.mrb[22].mxu1 }
 0x34b   :  { %v7572_v56 = vpop.f32.mrb[23].mxu1  ;;  %v7665_v53 = vadd.f32 %v7570_v52, %v1667_v34  ;;  %v7678_v52 = vsub.f32 %v7618_v45, %v8169_v25 }
 0x34c   :  { %v7668_v0 = vadd.f32 %v7572_v56, %v1662_v28 }
 0x3b7   :  { %v5561_v44 = vpop.f32.mrb[4].mxu0 }
 0x3b8   :  { %v6448_v11 = vadd.f32 %v5561_v44, %v1808_v51  ;;  %v2806_v13 = vpop.f32.mrb[5].mxu0  ;;  %v7693_v51 = vsub.f32 %v7631_v32, %v8168_v30 }
 0x3b9   :  { %v6450_v17 = vadd.f32 %v2806_v13, %v1798_v24 }
 0x3ba   :  { %v2901_v58 = vmax.f32 %v6448_v11, 0.0  ;;  %v7697_v11 = vsub.f32 %v2923_v26, %v7672_v49 }
 0x3bb   :  { %v2900_v63 = vmax.f32 %v6450_v17, 0.0  ;;  %v5564_v8 = vpop.f32.mrb[6].mxu0 }
 0x3bc   :  { %v2976_v43 = vand.u32 4294901760, %v2901_v58  ;;  %v6452_v6 = vadd.f32 %v5564_v8, %v1828_v47  ;;  %v2818_v48 = vpop.f32.mrb[7].mxu0 }
 0x3bd   :  { %v2973_v59 = vand.u32 4294901760, %v2900_v63  ;;  %v6454_v7 = vadd.f32 %v2818_v48, %v1818_v38 }
 0x3be   :  { %v7680_v56 = vsub.f32 %v2901_v58, %v2976_v43  ;;  %v2903_v18 = vmax.f32 %v6452_v6, 0.0 }
 0x3bf   :  { %v7686_v9 = vpack.c.bf16 %v2976_v43, %v2973_v59  ;;  %v7688_v55 = vsub.f32 %v2900_v63, %v2973_v59  ;;  %v2902_v19 = vmax.f32 %v6454_v7, 0.0  ;;  %v5567_v4 = vpop.f32.mrb[8].mxu0 }
 0x3c0   :  { %v8179_v24 = vand.u32 4294901760, %v7680_v56  ;;  %v2982_v47 = vand.u32 4294901760, %v2903_v18  ;;  %v6456_v38 = vadd.f32 %v5567_v4, %v1848_v10  ;;  %v2830_v44 = vpop.f32.mrb[9].mxu0 }
 0x3c1   :  { %v8180_v36 = vand.u32 4294901760, %v7688_v55  ;;  %v2979_v13 = vand.u32 4294901760, %v2902_v19  ;;  %v6458_v17 = vadd.f32 %v2830_v44, %v1838_v29  ;;  %6148 = vmatprep.subr.bf16.mxu1 %v7686_v9  ;;  %v7703_v28 = vpack.c.bf16 %v7680_v56, %v7688_v55 }
 0x3c2   :  { %v7705_v34 = vsub.f32 %v2903_v18, %v2982_v47  ;;  %v2905_v58 = vmax.f32 %v6456_v38, 0.0  ;;  %6150 = vmatpush3.bf16.msra.mxu1 %v7686_v9  ;;  %v3144_v10 = vsub.f32 %v7680_v56, %v8179_v24  ;;  %v8215_v60 = vand.u32 4294901760, %v7688_v55 }
 0x3c3   :  { %v7712_v63 = vpack.c.bf16 %v2982_v47, %v2979_v13  ;;  %v7714_v29 = vsub.f32 %v2902_v19, %v2979_v13  ;;  %v2904_v8 = vmax.f32 %v6458_v17, 0.0  ;;  %v5570_v43 = vpop.f32.mrb[10].mxu0  ;;  %v3137_v6 = vsub.f32 %v7688_v55, %v8180_v36 }
 0x3c4   :  { %v8175_v48 = vand.u32 4294901760, %v7705_v34  ;;  %v2988_v59 = vand.u32 4294901760, %v2905_v58  ;;  %v6460_v7 = vadd.f32 %v5570_v43, %v7620_v33  ;;  %v2842_v18 = vpop.f32.mrb[11].mxu0  ;;  %v3145_v4 = vand.u32 4294901760, %v3144_v10 }
 0x3c5   :  { %8209 = vst [vmem:[#allocation10_spill] sm:$0xff] %v7712_v63  ;;  %v8177_v38 = vand.u32 4294901760, %v7714_v29  ;;  %v2985_v44 = vand.u32 4294901760, %v2904_v8  ;;  %v6462_v47 = vadd.f32 %v2842_v18, %v7624_v61  ;;  %6152 = vmatprep.subr.bf16.mxu1 %v7712_v63  ;;  %v3138_v19 = vand.u32 4294901760, %v3137_v6 }
 0x3c6   :  { %v7724_v13 = vsub.f32 %v2905_v58, %v2988_v59  ;;  %v2907_v17 = vmax.f32 %v6460_v7, 0.0  ;;  %6154 = vmatpush3.bf16.msra.mxu1 %v7712_v63  ;;  %v3158_v30 = vsub.f32 %v7705_v34, %v8175_v48  ;;  %v7732_v33 = vpack.c.bf16 %v7705_v34, %v7714_v29 }
 0x3c7   :  { %v7734_v10 = vpack.c.bf16 %v2988_v59, %v2985_v44  ;;  %v7736_v43 = vsub.f32 %v2904_v8, %v2985_v44  ;;  %v2906_v61 = vmax.f32 %v6462_v47, 0.0  ;;  %v5573_v18 = vpop.f32.mrb[12].mxu0  ;;  %v7738_v6 = vpack.c.bf16 %v3145_v4, %v3138_v19 }
 0x3c8   :  { %v8173_v58 = vand.u32 4294901760, %v7724_v13  ;;  %v2994_v7 = vand.u32 4294901760, %v2907_v17  ;;  %v6464_v25 = vadd.f32 %v5573_v18, %v7626_v41  ;;  %v2854_v46 = vpop.f32.mrb[13].mxu0  ;;  %v3151_v62 = vsub.f32 %v7714_v29, %v8177_v38 }
 0x3c9   :  { %8210 = vst [vmem:[#allocation11_spill] sm:$0xff] %v7734_v10  ;;  %v8174_v54 = vand.u32 4294901760, %v7736_v43  ;;  %v2991_v59 = vand.u32 4294901760, %v2906_v61  ;;  %v6466_v8 = vadd.f32 %v2854_v46, %v7628_v1  ;;  %6156 = vmatprep.subr.bf16.mxu1 %v7734_v10  ;;  %v3159_v44 = vand.u32 4294901760, %v3158_v30 }
 0x3ca   :  { %v7748_v4 = vsub.f32 %v2907_v17, %v2994_v7  ;;  %v2909_v47 = vmax.f32 %v6464_v25, 0.0  ;;  %6158 = vmatpush3.bf16.msra.mxu1 %v7734_v10  ;;  %v3152_v19 = vand.u32 4294901760, %v3151_v62  ;;  %v3172_v41 = vsub.f32 %v7724_v13, %v8173_v58 }
 0x3cb   :  { %v7754_v18 = vpack.c.bf16 %v2994_v7, %v2991_v59  ;;  %v7756_v26 = vsub.f32 %v2906_v61, %v2991_v59  ;;  %v2908_v27 = vmax.f32 %v6466_v8, 0.0  ;;  %v5576_v40 = vpop.f32.mrb[14].mxu0  ;;  %v3165_v46 = vsub.f32 %v7736_v43, %v8174_v54 }
 0x3cc   :  { %v8176_v1 = vand.u32 4294901760, %v7748_v4  ;;  %v3000_v25 = vand.u32 4294901760, %v2909_v47  ;;  %v6468_v30 = vadd.f32 %v5576_v40, %v7636_v31  ;;  %v2866_v62 = vpop.f32.mrb[15].mxu0  ;;  %v7763_v17 = vpack.c.bf16 %v3159_v44, %v3152_v19 }
 0x3cd   :  { %8211 = vst [vmem:[#allocation12_spill] sm:$0xff] %v7754_v18  ;;  %v8178_v23 = vand.u32 4294901760, %v7756_v26  ;;  %v2997_v7 = vand.u32 4294901760, %v2908_v27  ;;  %v6470_v61 = vadd.f32 %v2866_v62, %v7638_v39  ;;  %6160 = vmatprep.subr.bf16.mxu1 %v7754_v18  ;;  %v3166_v59 = vand.u32 4294901760, %v3165_v46 }
 0x3ce   :  { %v7768_v8 = vsub.f32 %v2909_v47, %v3000_v25  ;;  %v2911_v58 = vmax.f32 %v6468_v30, 0.0  ;;  %6162 = vmatpush3.bf16.msra.mxu1 %v7754_v18  ;;  %v3173_v54 = vand.u32 4294901760, %v3172_v41  ;;  %v3186_v31 = vsub.f32 %v7748_v4, %v8176_v1 }
 0x3cf   :  { %v7774_v40 = vpack.c.bf16 %v3000_v25, %v2997_v7  ;;  %v7776_v44 = vsub.f32 %v2908_v27, %v2997_v7  ;;  %v2910_v19 = vmax.f32 %v6470_v61, 0.0  ;;  %v5579_v48 = vpop.f32.mrb[16].mxu0  ;;  %v3179_v39 = vsub.f32 %v7756_v26, %v8178_v23 }
 0x3d0   :  { %v8183_v47 = vand.u32 4294901760, %v7768_v8  ;;  %v3006_v46 = vand.u32 4294901760, %v2911_v58  ;;  %v6472_v30 = vadd.f32 %v5579_v48, %v7645_v16  ;;  %v2878_v41 = vpop.f32.mrb[17].mxu0  ;;  %v7783_v62 = vpack.c.bf16 %v3173_v54, %v3166_v59 }
 0x3d1   :  { %8212 = vst [vmem:[#allocation13_spill] sm:$0xff] %v7774_v40  ;;  %v8184_v1 = vand.u32 4294901760, %v7776_v44  ;;  %v3003_v25 = vand.u32 4294901760, %v2910_v19  ;;  %v6474_v27 = vadd.f32 %v2878_v41, %v7657_v57  ;;  %6164 = vmatprep.subr.bf16.mxu1 %v7774_v40  ;;  %v3180_v7 = vand.u32 4294901760, %v3179_v39 }
 0x3d2   :  { %v7788_v61 = vsub.f32 %v2911_v58, %v3006_v46  ;;  %v2913_v38 = vmax.f32 %v6472_v30, 0.0  ;;  %6166 = vmatpush3.bf16.msra.mxu1 %v7774_v40  ;;  %v3187_v23 = vand.u32 4294901760, %v3186_v31  ;;  %v3200_v16 = vsub.f32 %v7768_v8, %v8183_v47 }
 0x3d3   :  { %v7794_v54 = vpack.c.bf16 %v3006_v46, %v3003_v25  ;;  %v3205_v48 = vsub.f32 %v2910_v19, %v3003_v25  ;;  %v2912_v59 = vmax.f32 %v6474_v27, 0.0  ;;  %v5582_v24 = vpop.f32.mrb[18].mxu0  ;;  %v3193_v57 = vsub.f32 %v7776_v44, %v8184_v1 }
 0x3d4   :  { %v3213_v58 = vand.u32 4294901760, %v7788_v61  ;;  %v3012_v39 = vand.u32 4294901760, %v2913_v38  ;;  %v6476_v30 = vadd.f32 %v5582_v24, %v7665_v53  ;;  %v2890_v41 = vpop.f32.mrb[19].mxu0  ;;  %v7801_v31 = vpack.c.bf16 %v3187_v23, %v3180_v7 }
 0x3d5   :  { %8213 = vst [vmem:[#allocation14_spill] sm:$0xff] %v7794_v54  ;;  %v3206_v36 = vand.u32 4294901760, %v3205_v48  ;;  %v3009_v40 = vand.u32 4294901760, %v2912_v59  ;;  %v6478_v46 = vadd.f32 %v2890_v41, %v7668_v0  ;;  %6168 = vmatprep.subr.bf16.mxu1 %v7794_v54  ;;  %v3194_v19 = vand.u32 4294901760, %v3193_v57 }
 0x3d6   :  { %v3226_v25 = vsub.f32 %v2913_v38, %v3012_v39  ;;  %v2915_v27 = vmax.f32 %v6476_v30, 0.0  ;;  %6170 = vmatpush3.bf16.msra.mxu1 %v7794_v54  ;;  %v3201_v47 = vand.u32 4294901760, %v3200_v16  ;;  %v3214_v1 = vsub.f32 %v7788_v61, %v3213_v58 }
 0x3d7   :  { %v7807_v18 = vpack.c.bf16 %v3012_v39, %v3009_v40  ;;  %v3219_v53 = vsub.f32 %v2912_v59, %v3009_v40  ;;  %v2914_v24 = vmax.f32 %v6478_v46, 0.0  ;;  %v3207_v23 = vsub.f32 %v3205_v48, %v3206_v36 }
 0x3d8   :  { %v3227_v7 = vand.u32 4294901760, %v3226_v25  ;;  %v3018_v10 = vand.u32 4294901760, %v2915_v27  ;;  %v7809_v32 = vpack.c.bf16 %v3201_v47, %v3194_v19  ;;  %v3215_v0 = vand.u32 4294901760, %v3214_v1 }
 0x3d9   :  { %8214 = vst [vmem:[#allocation15_spill] sm:$0xff] %v7807_v18  ;;  %v3220_v41 = vand.u32 4294901760, %v3219_v53  ;;  %v3015_v45 = vand.u32 4294901760, %v2914_v24  ;;  %6172 = vmatprep.subr.bf16.mxu1 %v7807_v18  ;;  %v3208_v38 = vand.u32 4294901760, %v3207_v23  ;;  %v7814_v16 = vpack.c.bf16 %v7724_v13, %v7736_v43 }
 0x3da   :  { %v3240_v57 = vsub.f32 %v2915_v27, %v3018_v10  ;;  %6174 = vmatpush3.bf16.msra.mxu1 %v7807_v18  ;;  %v3228_v40 = vsub.f32 %v3226_v25, %v3227_v7  ;;  %v7819_v59 = vpack.c.bf16 %v7748_v4, %v7756_v26  ;;  %v7823_v1 = vpack.c.bf16 %v7768_v8, %v7776_v44 }
 0x3db   :  { %v7825_v47 = vpack.c.bf16 %v3018_v10, %v3015_v45  ;;  %v3233_v39 = vsub.f32 %v2914_v24, %v3015_v45  ;;  %v6199_v30 = vpack.c.bf16 %v3215_v0, %v3208_v38  ;;  %v3221_v46 = vsub.f32 %v3219_v53, %v3220_v41 }
 0x3dc   :  { %v3241_v19 = vand.u32 4294901760, %v3240_v57  ;;  %v3229_v23 = vand.u32 4294901760, %v3228_v40  ;;  %v7828_v27 = vpack.c.bf16 %v7788_v61, %v3205_v48  ;;  %v7830_v18 = vpack.c.bf16 %v3226_v25, %v3219_v53 }
 0x3dd   :  { %v3234_v54 = vand.u32 4294901760, %v3233_v39  ;;  %6176 = vmatprep.subr.bf16.mxu1 %v7825_v47  ;;  %v3222_v63 = vand.u32 4294901760, %v3221_v46  ;;  %v7833_v42 = vpack.c.bf16 %v3240_v57, %v3233_v39  ;;  %v8216_v10 = vand.u32 4294901760, %v7680_v56 }
 0x3de   :  { %6178 = vmatpush3.bf16.msra.mxu1 %v7825_v47  ;;  %v3242_v24 = vsub.f32 %v3240_v57, %v3241_v19  ;;  %v8217_v61 = vand.u32 4294901760, %v7714_v29  ;;  %v8218_v48 = vand.u32 4294901760, %v7705_v34  ;;  %v8219_v53 = vand.u32 4294901760, %v7736_v43 }
 0x3df   :  { %v7839_v45 = vpack.c.bf16 %v8216_v10, %v8215_v60  ;;  %v8220_v0 = vand.u32 4294901760, %v7724_v13  ;;  %v8221_v55 = vand.u32 4294901760, %v7756_v26  ;;  %v8222_v60 = vand.u32 4294901760, %v7748_v4  ;;  %6180 = vmatprep.subr.bf16.mxu1 %v7738_v6 }
 0x3e0   :  { %v7846_v25 = vpack.c.bf16 %v8218_v48, %v8217_v61  ;;  %v6203_v57 = vpack.c.bf16 %v3229_v23, %v3222_v63  ;;  %v3235_v29 = vsub.f32 %v3233_v39, %v3234_v54  ;;  %v8223_v34 = vand.u32 4294901760, %v7776_v44 }
 0x3e1   :  { %v7852_v38 = vpack.c.bf16 %v8220_v0, %v8219_v53  ;;  %v7858_v56 = vpack.c.bf16 %v8222_v60, %v8221_v55  ;;  %v8224_v40 = vand.u32 4294901760, %v7768_v8  ;;  %v7867_v43 = vpack.c.bf16 %v3213_v58, %v3206_v36 }
 0x3e2   :  { %v3243_v13 = vand.u32 4294901760, %v3242_v24  ;;  %v7869_v10 = vpack.c.bf16 %v3227_v7, %v3220_v41  ;;  %v7871_v26 = vpack.c.bf16 %v3241_v19, %v3234_v54  ;;  %v8225_v4 = vand.u32 4294901760, %v7643_v14 }
 0x3e3   :  { %v7865_v46 = vpack.c.bf16 %v8224_v40, %v8223_v34  ;;  %v3087_v61 = vand.u32 4294901760, %v7678_v52  ;;  %v8226_v63 = vand.u32 4294901760, %v7660_v35  ;;  %v3236_v39 = vand.u32 4294901760, %v3235_v29 }
 0x3e4   :  { %5616 = vmatmul.mubr.f32.vlgmr.msra.gmra.mrb[24].mxu1 %v8225_v4  ;;  %v3125_v8 = vand.u32 4294901760, %v7697_v11  ;;  %v8227_v36 = vand.u32 4294901760, %v7650_v21  ;;  %v3097_v54 = vand.u32 4294901760, %v7693_v51  ;;  %v8228_v58 = vand.u32 4294901760, %v7684_v37 }
 0x3e5   :  { %v3106_v44 = vsub.f32 %v7660_v35, %v8226_v63  ;;  %6182 = vmatpush3.bf16.msra.mxu1 %v7738_v6  ;;  %v6207_v52 = vpack.c.bf16 %v3243_v13, %v3236_v39  ;;  %v8232_v6 = vld [vmem:[#allocation8_spill] sm:$0xff]  ;;  %v8244_v23 = vmov %v8226_v63 }
 0x3e6   :  { %5618 = vmatprep.mubr.f32.mxu1 %v8227_v36  ;;  %v3116_v14 = vsub.f32 %v7684_v37, %v8228_v58  ;;  %6184 = vmatprep.subr.bf16.mxu1 %v7763_v17  ;;  %v3126_v41 = vsub.f32 %v7697_v11, %v3125_v8 }
 0x3e7   :  { %v3107_v7 = vand.u32 4294901760, %v3106_v44 }
 0x3e8   :  { %5619 = vmatmul.mubr.f32.gmra.mrb[26].mxu1 %v3087_v61  ;;  %v3117_v21 = vand.u32 4294901760, %v3116_v14  ;;  %v3127_v51 = vand.u32 4294901760, %v3126_v41 }
 0x3e9   :  { %6186 = vmatpush3.bf16.msra.mxu1 %v7763_v17  ;;  %5621 = vmatprep.mubr.f32.mxu1 %v3097_v54  ;;  %v8233_v17 = vld [vmem:[#allocation9_spill] sm:$0xff] }
 0x3ea   :  { %6188 = vmatprep.subr.bf16.mxu1 %v7783_v62  ;;  %v8243_v19 = vand.u32 4294901760, %v8233_v17 }
 0x3ec   :  { %5622 = vmatmul.mubr.f32.gmra.mrb[28].mxu1 %v3107_v7 }
 0x3ed   :  { %6190 = vmatpush3.bf16.msra.mxu1 %v7783_v62  ;;  %5624 = vmatprep.mubr.f32.mxu1 %v3117_v21  ;;  %v8236_v62 = vand.u32 4294901760, %v7580_v12 }
 0x3ee   :  { %6192 = vmatprep.subr.bf16.mxu1 %v7801_v31 }
 0x3f0   :  { %5625 = vmatmul.mubr.f32.gmra.mrb[30].mxu1 %v3127_v51 }
 0x3f1   :  { %6194 = vmatpush3.bf16.msra.mxu1 %v7801_v31  ;;  %5659 = vmatprep.mubr.f32.mxu1 %v7577_v3  ;;  %v8237_v31 = vld [vmem:[#allocation13_spill] sm:$0xff] }
 0x3f2   :  { %6196 = vmatprep.subr.bf16.mxu1 %v7809_v32 }
 0x3f5   :  { %6198 = vmatpush3.bf16.msra.mxu1 %v7809_v32  ;;  %v8229_v32 = vld [vmem:[#allocation6_spill] sm:$0xff] }
 0x3f6   :  { %6200 = vmatprep.subr.bf16.mxu1 %v6199_v30 }
 0x3f9   :  { %6202 = vmatpush3.bf16.msra.mxu1 %v6199_v30  ;;  %v8242_v30 = vand.u32 4294901760, %v8232_v6 }
 0x3fa   :  { %6204 = vmatprep.subr.bf16.mxu1 %v6203_v57 }
 0x3fd   :  { %6206 = vmatpush3.bf16.msra.mxu1 %v6203_v57 }
 0x3fe   :  { %6208 = vmatprep.subr.bf16.mxu1 %v6207_v52 }
 0x401   :  { %6210 = vmatpush3.bf16.msra.mxu1 %v6207_v52 }
 0x402   :  { %6212 = vmatprep.subr.bf16.mxu1 %v7703_v28 }
 0x404   :  { %5660 = vmatmul.mubr.f32.vlgmr.msra.gmra.mrb[24].mxu1 %v7592_v22 }
 0x405   :  { %6214 = vmatpush3.bf16.msra.mxu1 %v7703_v28  ;;  %5662 = vmatprep.mubr.f32.mxu1 %v7594_v2  ;;  %v8230_v28 = vld [vmem:[#allocation7_spill] sm:$0xff] }
 0x406   :  { %6216 = vmatprep.subr.bf16.mxu1 %v7732_v33 }
 0x408   :  { %5663 = vmatmul.mubr.f32.gmra.mrb[26].mxu1 %v7608_v5 }
 0x409   :  { %6218 = vmatpush3.bf16.msra.mxu1 %v7732_v33  ;;  %5665 = vmatprep.mubr.f32.mxu1 %v7610_v50  ;;  %v8231_v33 = vld [vmem:[#allocation10_spill] sm:$0xff] }
 0x40a   :  { %6220 = vmatprep.subr.bf16.mxu1 %v7814_v16 }
 0x40c   :  { %5666 = vmatmul.mubr.f32.gmra.mrb[28].mxu1 %v7622_v20 }
 0x40d   :  { %6222 = vmatpush3.bf16.msra.mxu1 %v7814_v16  ;;  %5668 = vmatprep.mubr.f32.mxu1 %v7662_v15  ;;  %v8238_v16 = vld [vmem:[#allocation14_spill] sm:$0xff] }
 0x40e   :  { %6224 = vmatprep.subr.bf16.mxu1 %v7819_v59 }
 0x410   :  { %5669 = vmatmul.mubr.f32.gmra.mrb[30].mxu1 %v7672_v49 }
 0x411   :  { %6226 = vmatpush3.bf16.msra.mxu1 %v7819_v59  ;;  %5703 = vmatprep.mubr.f32.mxu1 %v7580_v12  ;;  %v8239_v59 = vld [vmem:[#allocation15_spill] sm:$0xff]  ;;  %v8240_v12 = vand.u32 4294901760, %v8229_v32 }
 0x412   :  { %6228 = vmatprep.subr.bf16.mxu1 %v7823_v1 }
 0x415   :  { %6230 = vmatpush3.bf16.msra.mxu1 %v7823_v1  ;;  %v8241_v1 = vand.u32 4294901760, %v8230_v28 }
 0x416   :  { %6232 = vmatprep.subr.bf16.mxu1 %v7828_v27 }
 0x419   :  { %6234 = vmatpush3.bf16.msra.mxu1 %v7828_v27  ;;  %v8245_v27 = vmov %v8228_v58 }
 0x41a   :  { %6236 = vmatprep.subr.bf16.mxu1 %v7830_v18 }
 0x41d   :  { %6238 = vmatpush3.bf16.msra.mxu1 %v7830_v18  ;;  %v8234_v18 = vld [vmem:[#allocation11_spill] sm:$0xff] }
 0x41e   :  { %6240 = vmatprep.subr.bf16.mxu1 %v7833_v42 }
 0x421   :  { %6242 = vmatpush3.bf16.msra.mxu1 %v7833_v42  ;;  %v8235_v42 = vld [vmem:[#allocation12_spill] sm:$0xff] }
 0x422   :  { %6244 = vmatprep.subr.bf16.mxu1 %v7686_v9 }
 0x424   :  { %5704 = vmatmul.mubr.f32.vlgmr.msra.gmra.mrb[24].mxu1 %v8229_v32 }
 0x425   :  { %6246 = vmatpush3.bf16.msra.mxu1 %v7686_v9  ;;  %5706 = vmatprep.mubr.f32.mxu1 %v8230_v28 }
 0x426   :  { %6248 = vmatprep.subr.bf16.mxu1 %v8231_v33 }
 0x428   :  { %5707 = vmatmul.mubr.f32.gmra.mrb[26].mxu1 %v8232_v6 }
 0x429   :  { %6250 = vmatpush3.bf16.msra.mxu1 %v8231_v33  ;;  %5709 = vmatprep.mubr.f32.mxu1 %v8233_v17 }
 0x42a   :  { %6252 = vmatprep.subr.bf16.mxu1 %v8234_v18 }
 0x42c   :  { %5710 = vmatmul.mubr.f32.gmra.mrb[28].mxu1 %v7660_v35 }
 0x42d   :  { %6254 = vmatpush3.bf16.msra.mxu1 %v8234_v18  ;;  %5712 = vmatprep.mubr.f32.mxu1 %v7684_v37 }
 0x42e   :  { %6256 = vmatprep.subr.bf16.mxu1 %v8235_v42 }
 0x430   :  { %5713 = vmatmul.mubr.f32.gmra.mrb[30].mxu1 %v7697_v11  ;;  %v2935_v11 = vpop.permute.xlu0 %2934 }
 0x431   :  { %6258 = vmatpush3.bf16.msra.mxu1 %v8235_v42  ;;  %5747 = vmatprep.mubr.f32.mxu1 %v8236_v62 }
 0x432   :  { %6260 = vmatprep.subr.bf16.mxu1 %v8237_v31 }
 0x434   :  { %v2945_v55 = vpop.permute.xlu0 %2944 }
 0x435   :  { %6262 = vmatpush3.bf16.msra.mxu1 %v8237_v31 }
 0x436   :  { %6264 = vmatprep.subr.bf16.mxu1 %v8238_v16 }
 0x439   :  { %6266 = vmatpush3.bf16.msra.mxu1 %v8238_v16 }
 0x43a   :  { %6268 = vmatprep.subr.bf16.mxu1 %v8239_v59 }
 0x43d   :  { %6270 = vmatpush3.bf16.msra.mxu1 %v8239_v59 }
 0x43e   :  { %6272 = vmatprep.subr.bf16.mxu1 %v7825_v47 }
 0x441   :  { %6274 = vmatpush3.bf16.msra.mxu1 %v7825_v47 }
 0x442   :  { %6276 = vmatprep.subr.bf16.mxu1 %v7839_v45 }
 0x444   :  { %5748 = vmatmul.mubr.f32.vlgmr.msra.gmra.mrb[24].mxu1 %v8240_v12 }
 0x445   :  { %6278 = vmatpush3.bf16.msra.mxu1 %v7839_v45  ;;  %5750 = vmatprep.mubr.f32.mxu1 %v8241_v1 }
 0x446   :  { %6280 = vmatprep.subr.bf16.mxu1 %v7846_v25 }
 0x448   :  { %5751 = vmatmul.mubr.f32.gmra.mrb[26].mxu1 %v8242_v30 }
 0x449   :  { %6282 = vmatpush3.bf16.msra.mxu1 %v7846_v25  ;;  %5753 = vmatprep.mubr.f32.mxu1 %v8243_v19 }
 0x44a   :  { %6284 = vmatprep.subr.bf16.mxu1 %v7852_v38 }
 0x44c   :  { %5754 = vmatmul.mubr.f32.gmra.mrb[28].mxu1 %v8244_v23 }
 0x44d   :  { %6286 = vmatpush3.bf16.msra.mxu1 %v7852_v38  ;;  %5756 = vmatprep.mubr.f32.mxu1 %v8245_v27 }
 0x44e   :  { %6288 = vmatprep.subr.bf16.mxu1 %v7858_v56 }
 0x450   :  { %5757 = vmatmul.mubr.f32.gmra.mrb[30].mxu1 %v3125_v8  ;;  %v2955_v8 = vpop.permute.xlu0 %2954 }
 0x451   :  { %6290 = vmatpush3.bf16.msra.mxu1 %v7858_v56  ;;  %5791 = vmatprep.mubr.f32.mxu1 %v7577_v3 }
 0x452   :  { %6292 = vmatprep.subr.bf16.mxu1 %v7865_v46 }
 0x455   :  { %6294 = vmatpush3.bf16.msra.mxu1 %v7865_v46 }
 0x456   :  { %6296 = vmatprep.subr.bf16.mxu1 %v7867_v43 }
 0x459   :  { %6298 = vmatpush3.bf16.msra.mxu1 %v7867_v43 }
 0x45a   :  { %6300 = vmatprep.subr.bf16.mxu1 %v7869_v10 }
 0x45d   :  { %6302 = vmatpush3.bf16.msra.mxu1 %v7869_v10 }
 0x45e   :  { %6304 = vmatprep.subr.bf16.mxu1 %v7871_v26 }
 0x461   :  { %6306 = vmatpush3.bf16.msra.mxu1 %v7871_v26 }
 0x462   :  { %6308 = vmatprep.subr.bf16.mxu1 %v7686_v9 }
 0x464   :  { %5792 = vmatmul.mubr.f32.vlgmr.msra.gmra.mrb[24].mxu1 %v7592_v22 }
 0x465   :  { %6310 = vmatpush3.bf16.msra.mxu1 %v7686_v9  ;;  %5794 = vmatprep.mubr.f32.mxu1 %v7594_v2  ;;  %v2940_v9 = vpop.permute.xlu1 %2939 }
 0x466   :  { %6312 = vmatprep.subr.bf16.mxu1 %v8231_v33 }
 0x468   :  { %5795 = vmatmul.mubr.f32.gmra.mrb[26].mxu1 %v7608_v5 }
 0x469   :  { %6314 = vmatpush3.bf16.msra.mxu1 %v8231_v33  ;;  %5797 = vmatprep.mubr.f32.mxu1 %v7610_v50  ;;  %v2950_v53 = vpop.permute.xlu1 %2949 }
 0x46a   :  { %6316 = vmatprep.subr.bf16.mxu1 %v8234_v18 }
 0x46c   :  { %5798 = vmatmul.mubr.f32.gmra.mrb[28].mxu1 %v7622_v20 }
 0x46d   :  { %6318 = vmatpush3.bf16.msra.mxu1 %v8234_v18  ;;  %5800 = vmatprep.mubr.f32.mxu1 %v7662_v15  ;;  %v2960_v63 = vpop.permute.xlu1 %2959 }
 0x46e   :  { %6320 = vmatprep.subr.bf16.mxu1 %v8235_v42 }
 0x470   :  { %5801 = vmatmul.mubr.f32.gmra.mrb[30].mxu1 %v7672_v49 }
 0x471   :  { %6322 = vmatpush3.bf16.msra.mxu1 %v8235_v42  ;;  %5835 = vmatprep.mubr.f32.mxu1 %v7577_v3  ;;  %v3922_v3 = vld [vmem:[%s8161_s9] sm:$0xff]  ;;  %v2970_v1 = vpop.permute.xlu1 %2969 }
 0x472   :  { %6324 = vmatprep.subr.bf16.mxu1 %v8237_v31  ;;  %v3951_v35 = vsel %vm1669_vm2, %v3922_v3, 0 }
 0x473   :  { %v8014_v37 = vand.u32 4294901760, %v3951_v35 }
 0x475   :  { %6326 = vmatpush3.bf16.msra.mxu1 %v8237_v31 }
 0x476   :  { %6328 = vmatprep.subr.bf16.mxu1 %v8238_v16 }
 0x479   :  { %6330 = vmatpush3.bf16.msra.mxu1 %v8238_v16 }
 0x47a   :  { %6332 = vmatprep.subr.bf16.mxu1 %v8239_v59 }
 0x47d   :  { %6334 = vmatpush3.bf16.msra.mxu1 %v8239_v59 }
 0x47e   :  { %6336 = vmatprep.subr.bf16.mxu1 %v7825_v47 }
 0x481   :  { %6338 = vmatpush3.bf16.msra.mxu1 %v7825_v47  ;;  %v3925_v47 = vld [vmem:[%s8161_s9 + $0x18] sm:$0xff] }
 0x482   :  { %v3960_v48 = vsel %vm1669_vm2, %v3925_v47, 0 }
 0x483   :  { %v8042_v57 = vand.u32 4294901760, %v3960_v48 }
 0x484   :  { %5836 = vmatmul.mubr.f32.vlgmr.msra.gmra.mrb[24].mxu1 %v7592_v22  ;;  %v8017_v22 = vsub.f32 %v3951_v35, %v8014_v37  ;;  %v2965_v35 = vpop.permute.xlu0 %2964 }
 0x485   :  { %5838 = vmatprep.mubr.f32.mxu1 %v7594_v2  ;;  %v8049_v61 = vsub.f32 %v3960_v48, %v8042_v57 }
 0x486   :  { %v4037_v2 = vand.u32 4294901760, %v8017_v22 }
 0x487   :  { %v4067_v6 = vand.u32 4294901760, %v8049_v61 }
 0x488   :  { %5839 = vmatmul.mubr.f32.gmra.mrb[26].mxu1 %v7608_v5  ;;  %v4038_v5 = vsub.f32 %v8017_v22, %v4037_v2 }
 0x489   :  { %5841 = vmatprep.mubr.f32.mxu1 %v7610_v50 }
 0x48a   :  { %v4039_v50 = vand.u32 4294901760, %v4038_v5 }
 0x48c   :  { %5842 = vmatmul.mubr.f32.gmra.mrb[28].mxu1 %v7622_v20  ;;  %5863 = vmatprep.mubr.f32.mxu0 %v4039_v50  ;;  %v3923_v20 = vld [vmem:[%s8161_s9 + $0x8] sm:$0xff] }
 0x48d   :  { %5844 = vmatprep.mubr.f32.mxu1 %v7662_v15  ;;  %v3954_v15 = vsel %vm1669_vm2, %v3923_v20, 0 }
 0x48e   :  { %v8033_v45 = vand.u32 4294901760, %v3954_v15 }
 0x490   :  { %5845 = vmatmul.mubr.f32.gmra.mrb[30].mxu1 %v7672_v49  ;;  %v3924_v49 = vld [vmem:[%s8161_s9 + $0x10] sm:$0xff]  ;;  %v8040_v38 = vsub.f32 %v3954_v15, %v8033_v45  ;;  %s6704_s9 = smov [#allocation3]  }
 0x491   :  { %v3957_v24 = vsel %vm1669_vm2, %v3924_v49, 0  ;;  %s4687_s3 = sshll.u32 %s6704_s9, 4  ;;  %s4688_s3 = int_to_ptr.vmem [resolvable:$true] %s4687_s3 }
 0x492   :  { %v8037_v25 = vand.u32 4294901760, %v3957_v24  ;;  %v4047_v13 = vand.u32 4294901760, %v8040_v38  ;;  %s6679_s29 = scalar_lea.vmem %s4688_s3, 16  ;;  %s6683_s30 = scalar_lea.vmem %s4688_s3, 32 }
 0x493   :  { %p6680_p0 = scmp.ne.s32.totalorder %s4688_s3, %s6679_s29  ;;  %p6684_p1 = scmp.lt.s32.totalorder %s4688_s3, %s4688_s3 }
 0x494   :  { %v8045_v40 = vsub.f32 %v3957_v24, %v8037_v25  ;;  %v8057_v21 = vsub.f32 %v8040_v38, %v4047_v13  ;;  %p6685_p2 = scmp.lt.s32.totalorder %s6683_s30, %s6679_s29 }
 0x496   :  { %v4057_v58 = vand.u32 4294901760, %v8045_v40  ;;  %p6686_p3 = por %p6685_p2, %p6684_p1 }
 0x498   :  { %v8067_v12 = vsub.f32 %v8045_v40, %v4057_v58  ;;  %p6687_p4 = pnand %p6686_p3, %p6680_p0 }
 0x557   :  { %v5837_v0 = vpop.f32.mrb[24].mxu1 }
 0x558   :  { %v6479_v60 = vadd.f32 %v5837_v0, %v2940_v9  ;;  %v3868_v56 = vpop.f32.mrb[25].mxu1 }
 0x559   :  { %v6480_v29 = vadd.f32 %v3868_v56, %v2935_v11 }
 0x55a   :  { %v3915_v34 = vmax.f32 %v6479_v60, 0.0 }
 0x55b   :  { %v3914_v46 = vmax.f32 %v6480_v29, 0.0  ;;  %v5840_v43 = vpop.f32.mrb[26].mxu1 }
 0x55c   :  { %v3966_v10 = vand.u32 4294901760, %v3915_v34  ;;  %v6481_v26 = vadd.f32 %v5840_v43, %v2950_v53  ;;  %v3880_v4 = vpop.f32.mrb[27].mxu1 }
 0x55d   :  { %v3963_v44 = vand.u32 4294901760, %v3914_v46  ;;  %v6482_v39 = vadd.f32 %v3880_v4, %v2945_v55 }
 0x55e   :  { %v4084_v36 = vsub.f32 %v3915_v34, %v3966_v10  ;;  %v3917_v54 = vmax.f32 %v6481_v26, 0.0 }
 0x55f   :  { %v8052_v14 = vpack.c.bf16 %v3966_v10, %v3963_v44  ;;  %v4077_v52 = vsub.f32 %v3914_v46, %v3963_v44  ;;  %v3916_v7 = vmax.f32 %v6482_v39, 0.0  ;;  %v5843_v41 = vpop.f32.mrb[28].mxu1 }
 0x560   :  { %v4085_v51 = vand.u32 4294901760, %v4084_v36  ;;  %v3972_v32 = vand.u32 4294901760, %v3917_v54  ;;  %v6483_v28 = vadd.f32 %v5843_v41, %v2960_v63  ;;  %v3892_v33 = vpop.f32.mrb[29].mxu1 }
 0x561   :  { %v4078_v17 = vand.u32 4294901760, %v4077_v52  ;;  %v3969_v18 = vand.u32 4294901760, %v3916_v7  ;;  %v6484_v42 = vadd.f32 %v3892_v33, %v2955_v8  ;;  %6340 = vmatprep.subr.bf16.mxu0 %v8052_v14  ;;  %v8061_v62 = vpack.c.bf16 %v4084_v36, %v4077_v52 }
 0x562   :  { %v4098_v31 = vsub.f32 %v3917_v54, %v3972_v32  ;;  %v3919_v16 = vmax.f32 %v6483_v28, 0.0  ;;  %6342 = vmatpush3.bf16.msra.mxu0 %v8052_v14  ;;  %v4086_v59 = vsub.f32 %v4084_v36, %v4085_v51 }
 0x563   :  { %v8069_v30 = vpack.c.bf16 %v3972_v32, %v3969_v18  ;;  %v4091_v19 = vsub.f32 %v3916_v7, %v3969_v18  ;;  %v3918_v23 = vmax.f32 %v6484_v42, 0.0  ;;  %v5846_v27 = vpop.f32.mrb[30].mxu1  ;;  %v4079_v3 = vsub.f32 %v4077_v52, %v4078_v17 }
 0x564   :  { %v4099_v5 = vand.u32 4294901760, %v4098_v31  ;;  %v3978_v50 = vand.u32 4294901760, %v3919_v16  ;;  %v6485_v20 = vadd.f32 %v5846_v27, %v2970_v1  ;;  %v3904_v15 = vpop.f32.mrb[31].mxu1  ;;  %v4087_v49 = vand.u32 4294901760, %v4086_v59 }
 0x565   :  { %v4092_v9 = vand.u32 4294901760, %v4091_v19  ;;  %v3975_v11 = vand.u32 4294901760, %v3918_v23  ;;  %v6486_v47 = vadd.f32 %v3904_v15, %v2965_v35  ;;  %6344 = vmatprep.subr.bf16.mxu0 %v8069_v30  ;;  %v4080_v24 = vand.u32 4294901760, %v4079_v3 }
 0x566   :  { %v4112_v48 = vsub.f32 %v3919_v16, %v3978_v50  ;;  %v3921_v53 = vmax.f32 %v6485_v20, 0.0  ;;  %6346 = vmatpush3.bf16.msra.mxu0 %v8069_v30  ;;  %v4100_v0 = vsub.f32 %v4098_v31, %v4099_v5  ;;  %v6375_v55 = vpack.c.bf16 %v4098_v31, %v4091_v19 }
 0x567   :  { %v8073_v60 = vpack.c.bf16 %v3978_v50, %v3975_v11  ;;  %v4105_v56 = vsub.f32 %v3918_v23, %v3975_v11  ;;  %v3920_v29 = vmax.f32 %v6486_v47, 0.0  ;;  %v6355_v34 = vpack.c.bf16 %v4087_v49, %v4080_v24 }
 0x568   :  { %v4113_v46 = vand.u32 4294901760, %v4112_v48  ;;  %v3984_v43 = vand.u32 4294901760, %v3921_v53  ;;  %v4093_v10 = vsub.f32 %v4091_v19, %v4092_v9  ;;  %v4101_v26 = vand.u32 4294901760, %v4100_v0 }
 0x569   :  { %v4106_v4 = vand.u32 4294901760, %v4105_v56  ;;  %v3981_v63 = vand.u32 4294901760, %v3920_v29  ;;  %6348 = vmatprep.subr.bf16.mxu0 %v8073_v60  ;;  %v6379_v44 = vpack.c.bf16 %v4112_v48, %v4105_v56  ;;  %v8076_v39 = vpack.c.bf16 %v4085_v51, %v4078_v17 }
 0x56a   :  { %v4126_v8 = vsub.f32 %v3921_v53, %v3984_v43  ;;  %6350 = vmatpush3.bf16.msra.mxu0 %v8073_v60  ;;  %v4094_v36 = vand.u32 4294901760, %v4093_v10  ;;  %v4114_v54 = vsub.f32 %v4112_v48, %v4113_v46  ;;  %v8079_v52 = vpack.c.bf16 %v4099_v5, %v4092_v9 }
 0x56b   :  { %v8081_v7 = vpack.c.bf16 %v3984_v43, %v3981_v63  ;;  %v4119_v41 = vsub.f32 %v3920_v29, %v3981_v63  ;;  %v4107_v32 = vsub.f32 %v4105_v56, %v4106_v4  ;;  %v8083_v28 = vpack.c.bf16 %v4113_v46, %v4106_v4 }
 0x56c   :  { %v4127_v33 = vand.u32 4294901760, %v4126_v8  ;;  %v4049_v18 = vand.u32 4294901760, %v8057_v21  ;;  %v6359_v42 = vpack.c.bf16 %v4101_v26, %v4094_v36  ;;  %v4115_v31 = vand.u32 4294901760, %v4114_v54 }
 0x56d   :  { %v4120_v51 = vand.u32 4294901760, %v4119_v41  ;;  %6352 = vmatprep.subr.bf16.mxu0 %v8081_v7  ;;  %v4108_v17 = vand.u32 4294901760, %v4107_v32  ;;  %v4068_v16 = vsub.f32 %v8049_v61, %v4067_v6  ;;  %v6383_v59 = vpack.c.bf16 %v4126_v8, %v4119_v41 }
 0x56e   :  { %6354 = vmatpush3.bf16.msra.mxu0 %v8081_v7  ;;  %v4128_v1 = vsub.f32 %v4126_v8, %v4127_v33  ;;  %v4059_v19 = vand.u32 4294901760, %v8067_v12 }
 0x56f   :  { %6356 = vmatprep.subr.bf16.mxu0 %v6355_v34  ;;  %v6363_v23 = vpack.c.bf16 %v4115_v31, %v4108_v17  ;;  %v4121_v27 = vsub.f32 %v4119_v41, %v4120_v51  ;;  %v6415_v21 = vpack.c.bf16 %v4127_v33, %v4120_v51  ;;  %v4069_v5 = vand.u32 4294901760, %v4068_v16 }
 0x570   :  { %v4129_v3 = vand.u32 4294901760, %v4128_v1 }
 0x571   :  { %5864 = vmatmul.mubr.f32.vlgmr.msra.gmra.mrb[20].mxu0 %v4049_v18  ;;  %v4122_v35 = vand.u32 4294901760, %v4121_v27 }
 0x572   :  { %6358 = vmatpush3.bf16.msra.mxu0 %v6355_v34  ;;  %5866 = vmatprep.mubr.f32.mxu0 %v4059_v19 }
 0x573   :  { %6360 = vmatprep.subr.bf16.mxu0 %v6359_v42  ;;  %v6367_v50 = vpack.c.bf16 %v4129_v3, %v4122_v35 }
 0x575   :  { %5867 = vmatmul.mubr.f32.gmra.mrb[22].mxu0 %v4069_v5 }
 0x576   :  { %6362 = vmatpush3.bf16.msra.mxu0 %v6359_v42  ;;  %5885 = vmatprep.mubr.f32.mxu0 %v8014_v37 }
 0x577   :  { %6364 = vmatprep.subr.bf16.mxu0 %v6363_v23 }
 0x57a   :  { %6366 = vmatpush3.bf16.msra.mxu0 %v6363_v23 }
 0x57b   :  { %6368 = vmatprep.subr.bf16.mxu0 %v6367_v50 }
 0x57e   :  { %6370 = vmatpush3.bf16.msra.mxu0 %v6367_v50 }
 0x57f   :  { %6372 = vmatprep.subr.bf16.mxu0 %v8061_v62 }
 0x581   :  { %5886 = vmatmul.mubr.f32.vlgmr.msra.gmra.mrb[20].mxu0 %v8033_v45 }
 0x582   :  { %6374 = vmatpush3.bf16.msra.mxu0 %v8061_v62  ;;  %5888 = vmatprep.mubr.f32.mxu0 %v8037_v25 }
 0x583   :  { %6376 = vmatprep.subr.bf16.mxu0 %v6375_v55 }
 0x585   :  { %5889 = vmatmul.mubr.f32.gmra.mrb[22].mxu0 %v8042_v57 }
 0x586   :  { %6378 = vmatpush3.bf16.msra.mxu0 %v6375_v55  ;;  %5907 = vmatprep.mubr.f32.mxu0 %v8017_v22  ;;  %v3933_v22 = vpop.permute.xlu0 %3932  ;;  %v4675_v55 = vlaneseq }
 0x587   :  { %6380 = vmatprep.subr.bf16.mxu0 %v6379_v44 }
 0x588   :  { %v4676_v29 = vshrl.u32 %v4675_v55, 7 }
 0x58a   :  { %6382 = vmatpush3.bf16.msra.mxu0 %v6379_v44  ;;  %v4677_v43 = vsub.s32 0, %v4676_v29 }
 0x58b   :  { %6384 = vmatprep.subr.bf16.mxu0 %v6383_v59 }
 0x58e   :  { %6386 = vmatpush3.bf16.msra.mxu0 %v6383_v59 }
 0x58f   :  { %6388 = vmatprep.subr.bf16.mxu0 %v8052_v14 }
 0x591   :  { %5908 = vmatmul.mubr.f32.vlgmr.msra.gmra.mrb[20].mxu0 %v8040_v38  ;;  %v3943_v38 = vpop.permute.xlu0 %3942 }
 0x592   :  { %6390 = vmatpush3.bf16.msra.mxu0 %v8052_v14  ;;  %5910 = vmatprep.mubr.f32.mxu0 %v8045_v40 }
 0x593   :  { %6392 = vmatprep.subr.bf16.mxu0 %v8069_v30 }
 0x595   :  { %5911 = vmatmul.mubr.f32.gmra.mrb[22].mxu0 %v8049_v61 }
 0x596   :  { %6394 = vmatpush3.bf16.msra.mxu0 %v8069_v30  ;;  %5929 = vmatprep.mubr.f32.mxu0 %v4037_v2  ;;  %v3938_v2 = vpop.permute.xlu1 %3937 }
 0x597   :  { %6396 = vmatprep.subr.bf16.mxu0 %v8073_v60 }
 0x59a   :  { %6398 = vmatpush3.bf16.msra.mxu0 %v8073_v60  ;;  %v3948_v40 = vpop.permute.xlu1 %3947 }
 0x59b   :  { %6400 = vmatprep.subr.bf16.mxu0 %v8081_v7 }
 0x59e   :  { %6402 = vmatpush3.bf16.msra.mxu0 %v8081_v7  ;;  %v4644_v62 = vpop.permute.xlu1 %4643 }
 0x59f   :  { %6404 = vmatprep.subr.bf16.mxu0 %v8076_v39 }
 0x5a1   :  { %5930 = vmatmul.mubr.f32.vlgmr.msra.gmra.mrb[20].mxu0 %v4047_v13 }
 0x5a2   :  { %6406 = vmatpush3.bf16.msra.mxu0 %v8076_v39  ;;  %5932 = vmatprep.mubr.f32.mxu0 %v4057_v58  ;;  %v4654_v48 = vpop.permute.xlu1 %4653 }
 0x5a3   :  { %6408 = vmatprep.subr.bf16.mxu0 %v8079_v52 }
 0x5a5   :  { %5933 = vmatmul.mubr.f32.gmra.mrb[22].mxu0 %v4067_v6 }
 0x5a6   :  { %6410 = vmatpush3.bf16.msra.mxu0 %v8079_v52  ;;  %5951 = vmatprep.mubr.f32.mxu0 %v8014_v37 }
 0x5a7   :  { %6412 = vmatprep.subr.bf16.mxu0 %v8083_v28 }
 0x5aa   :  { %6414 = vmatpush3.bf16.msra.mxu0 %v8083_v28 }
 0x5ab   :  { %6416 = vmatprep.subr.bf16.mxu0 %v6415_v21 }
 0x5ae   :  { %6418 = vmatpush3.bf16.msra.mxu0 %v6415_v21 }
 0x5af   :  { %6420 = vmatprep.subr.bf16.mxu0 %v8052_v14 }
 0x5b1   :  { %5952 = vmatmul.mubr.f32.vlgmr.msra.gmra.mrb[20].mxu0 %v8033_v45 }
 0x5b2   :  { %6422 = vmatpush3.bf16.msra.mxu0 %v8052_v14  ;;  %5954 = vmatprep.mubr.f32.mxu0 %v8037_v25  ;;  %v4639_v14 = vpop.permute.xlu0 %4638 }
 0x5b3   :  { %6424 = vmatprep.subr.bf16.mxu0 %v8069_v30 }
 0x5b5   :  { %5955 = vmatmul.mubr.f32.gmra.mrb[22].mxu0 %v8042_v57 }
 0x5b6   :  { %6426 = vmatpush3.bf16.msra.mxu0 %v8069_v30  ;;  %5973 = vmatprep.mubr.f32.mxu0 %v8014_v37  ;;  %v4649_v47 = vpop.permute.xlu0 %4648 }
 0x5b7   :  { %6428 = vmatprep.subr.bf16.mxu0 %v8073_v60 }
 0x5ba   :  { %6430 = vmatpush3.bf16.msra.mxu0 %v8073_v60  ;;  %v4673_v26 = vpop.permute.xlu0 %4672 }
 0x5bb   :  { %6432 = vmatprep.subr.bf16.mxu0 %v8081_v7  ;;  %v4678_v63 = vrot.slane %v4673_v26, %v4677_v43 }
 0x5be   :  { %6434 = vmatpush3.bf16.msra.mxu0 %v8081_v7 }
 0x5c1   :  { %5974 = vmatmul.mubr.f32.vlgmr.msra.gmra.mrb[20].mxu0 %v8033_v45 }
 0x5c2   :  { %5976 = vmatprep.mubr.f32.mxu0 %v8037_v25 }
 0x5c5   :  { %5977 = vmatmul.mubr.f32.gmra.mrb[22].mxu0 %v8042_v57 }
 0x694   :  { %v5975_v13 = vpop.f32.mrb[20].mxu0 }
 0x695   :  { %v6487_v37 = vadd.f32 %v5975_v13, %v3938_v2  ;;  %v4606_v61 = vpop.f32.mrb[21].mxu0 }
 0x696   :  { %v6488_v58 = vadd.f32 %v4606_v61, %v3933_v22 }
 0x697   :  { %v4629_v6 = vmax.f32 %v6487_v37, 0.0 }
 0x698   :  { %v4628_v12 = vmax.f32 %v6488_v58, 0.0  ;;  %v5978_v30 = vpop.f32.mrb[22].mxu0 }
 0x699   :  { %v4657_v20 = vmul.f32 %v4644_v62, %v4629_v6  ;;  %v6489_v15 = vadd.f32 %v5978_v30, %v3948_v40  ;;  %v4618_v45 = vpop.f32.mrb[23].mxu0 }
 0x69a   :  { %v4656_v49 = vmul.f32 %v4639_v14, %v4628_v12  ;;  %v6490_v25 = vadd.f32 %v4618_v45, %v3943_v38 }
 0x69b   :  { %v4631_v57 = vmax.f32 %v6489_v15, 0.0 }
 0x69c   :  { %v4660_v9 = vadd.f32 %v4657_v20, %v4656_v49  ;;  %v4630_v11 = vmax.f32 %v6490_v25, 0.0 }
 0x69d   :  { %v4659_v53 = vmul.f32 %v4654_v48, %v4631_v57 }
 0x69e   :  { %v4658_v24 = vmul.f32 %v4649_v47, %v4630_v11 }
 0x6a0   :  { %v4661_v0 = vadd.f32 %v4660_v9, %v4658_v24 }
 0x6a2   :  { %v4662_v60 = vadd.f32 %v4661_v0, %v4659_v53 }
 0x6a4   :  { %v4663_v56 = vrot.slane %v4662_v60, 4 }
 0x6a6   :  { %v4664_v34 = vadd.f32 %v4663_v56, %v4662_v60 }
 0x6a8   :  { %v4665_v46 = vrot.slane %v4664_v34, 2 }
 0x6aa   :  { %v4666_v10 = vadd.f32 %v4665_v46, %v4664_v34 }
 0x6ac   :  { %v4667_v4 = vrot.slane %v4666_v10, 1 }
 0x6ae   :  { %v4668_v44 = vadd.f32 %v4667_v4, %v4666_v10 }
 0x6b0   :  { %v4679_v39 = vadd.f32 %v4678_v63, %v4668_v44 }
 0x6b2   :  { %4680 = vst [vmem:[#allocation3] sm:$0x1] %v4679_v39 }
 0x6b3   :  { %6690 = shalt.err (!%p6687_p4)
}
 0x6b4   :  { %s6691_s5 = scalar_lea.hbm %s8165_s13, 16 }
 0x6b5   :  { %p6692_p5 = scmp.ne.s32.totalorder %s8165_s13, %s6691_s5  ;;  %p6695_p6 = scmp.lt.u32.totalorder %s6691_s5, %s8165_s13 }
 0x6b7   :  { %p6697_p7 = pnand %p6695_p6, %p6692_p5 }
 0x6b9   :  { %6700 = shalt.err (!%p6697_p7)
}
 0x6ba   :  { %4690 = dma.vmem_to_hbm [thread:$0]  %s4688_s3, 16, %s8165_s13, [#allocation4]  }
 0x6bb   :  { %6701 = dma.done.wait [#allocation4], 16  }
 0x6bc   :  { %6702 = vsyncadd [#allocation4], 4294967280 }
 0x6bd   :  { %4694 = vsyncpa [#allocation4], 1 }

</bundles_post_ra>
